<compile_context>
chip_gen: v7x
topology: tpu7x:2x2x1
jax: 0.10.0
libtpu: 0.0.40
codegen_flags: <defaults>
</compile_context>

<pallas_src>
import math

import jax
import jax.numpy as jnp
from jax.experimental import pallas as pl
from jax.experimental.pallas import tpu as pltpu


def _round_up(n, m):
    return ((n + m - 1) // m) * m


def simclr_kernel(x_ref, wp_ref, bp_ref, w1_ref, b1_ref, w2_ref, b2_ref, out_ref):
    """One batch tile of the fused forward pass.

    x_ref:   (TB, C*H*W) f32   flattened input tile (avg-pool folded into wp)
    wp_ref:  (C*H*W, 512)      expanded backbone projection (already scaled by 1/(H*W))
    bp_ref:  (1, 512) f32
    w1_ref:  (512, 256)        Linear(512, 256)
    b1_ref:  (1, 256) f32
    w2_ref:  (256, NC_PAD)     Linear(256, num_classes), lane-padded
    b2_ref:  (1, NC_PAD) f32
    out_ref: (TB, NC_PAD) f32
    """
    w_dt = wp_ref.dtype
    x = x_ref[...]

    # --- synthetic original_model: (global-avg-pool + Linear(C,512)) as one MXU matmul + ReLU ---
    feat = jnp.dot(x.astype(w_dt), wp_ref[...],
                   preferred_element_type=jnp.float32) + bp_ref[...]     # (TB, 512)
    feat = jnp.maximum(feat, 0.0)

    # --- classification head (Flatten is a no-op on (TB, 512)) ---
    h = jnp.dot(feat.astype(w_dt), w1_ref[...],
                preferred_element_type=jnp.float32) + b1_ref[...]        # (TB, 256)
    h = jnp.maximum(h, 0.0)                                              # ReLU

    # Dropout(0.5): identity in eval mode.
    # TODO(synk): training-mode dropout would need pltpu.prng_seed/prng_random_bits + 2x scale.

    logits = jnp.dot(h.astype(w_dt), w2_ref[...],
                     preferred_element_type=jnp.float32) + b2_ref[...]   # (TB, NC_PAD)
    out_ref[...] = jax.nn.sigmoid(logits)


def simclr_forward(x, params, *, weights_dtype=jnp.float32, batch_tile=None):
    """x: (B, C, H, W) f32, NCHW.  Returns (B, num_classes) f32 in [0, 1].

    weights_dtype: jnp.bfloat16 recommended on v6e/v7x (halves weight DMA/VMEM,
                   f32 accumulation preserved); f32 by default.
    batch_tile:    rows per grid step; defaults to 128 (full MXU rows) for large
                   B, or B rounded up to a sublane multiple for small B.
    """
    B, C, H, W = x.shape
    HW = H * W
    K = C * HW
    wp, bp, w1, b1, w2, b2 = params
    feat_dim = wp.shape[1]
    hidden = w1.shape[1]
    num_classes = w2.shape[1]

    # Fold the global average pool into the first projection:
    #   mean_s(x[b, c, s]) @ wp  ==  x_flat[b, c*HW + s] @ wp_exp,
    #   wp_exp[c*HW + s, :] = wp[c, :] / HW   (matches x.reshape(B, C*HW) order).
    # Expanded weight VMEM cost: K * feat_dim * 4B (2 MiB at the toy shape); if a
    # real backbone input makes this too large, tile the K axis and accumulate.
    wp_exp = jnp.broadcast_to((wp / HW)[:, None, :], (C, HW, feat_dim)).reshape(K, feat_dim)

    # Lane-dense output: pad num_classes up to a multiple of 128.
    nc_pad = _round_up(max(num_classes, 1), 128)
    w2p = jnp.zeros((hidden, nc_pad), w2.dtype).at[:, :num_classes].set(w2)
    b2p = jnp.zeros((1, nc_pad), jnp.float32).at[:, :num_classes].set(b2.astype(jnp.float32))

    # Matmul weights optionally narrowed; biases stay f32.
    wp_exp = wp_exp.astype(weights_dtype)
    w1c = w1.astype(weights_dtype)
    w2p = w2p.astype(weights_dtype)
    bp32 = bp.astype(jnp.float32)
    b132 = b1.astype(jnp.float32)

    # Batch tiling: 128-row tiles (full MXU rows; use 256 on v6e/v7x for big B),
    # pad small batches up to a sublane multiple so the block is (8,128)-legal.
    if batch_tile is None:
        batch_tile = 128 if B >= 128 else _round_up(B, 8)
    tb = batch_tile
    b_pad = _round_up(B, tb)

    x2d = x.reshape(B, K).astype(jnp.float32)
    if b_pad != B:
        x2d = jnp.pad(x2d, ((0, b_pad - B), (0, 0)))

    grid = (b_pad // tb,)
    # Weights/biases: untiled, single-buffered VMEM residents (not re-DMA'd per step).
    resident = pl.BlockSpec(memory_space=pltpu.MemorySpace.VMEM)

    out_pad = pl.pallas_call(
        simclr_kernel,
        out_shape=jax.ShapeDtypeStruct((b_pad, nc_pad), jnp.float32),
        grid=grid,
        in_specs=[
            pl.BlockSpec((tb, K), lambda i: (i, 0)),   # pipelined activation tiles
            resident, resident,                        # wp_exp, bp
            resident, resident,                        # w1, b1
            resident, resident,                        # w2, b2
        ],
        out_specs=pl.BlockSpec((tb, nc_pad), lambda i: (i, 0)),
        compiler_params=pltpu.CompilerParams(
            dimension_semantics=("parallel",)),        # independent batch tiles -> megacore on v7x
    )(x2d, wp_exp, bp32, w1c, b132, w2p, b2p)

    return out_pad[:B, :num_classes]


def init_params(key, in_ch, feat=512, hidden=256, num_classes=10):
    """Deterministic PyTorch-style uniform(-1/sqrt(fan_in), 1/sqrt(fan_in)) init."""
    ks = jax.random.split(key, 6)

    def unif(k, shape, fan_in):
        bound = 1.0 / math.sqrt(fan_in)
        return jax.random.uniform(k, shape, jnp.float32, -bound, bound)

    wp = unif(ks[0], (in_ch, feat), in_ch)           # synthetic backbone projection
    bp = unif(ks[1], (1, feat), in_ch)
    w1 = unif(ks[2], (feat, hidden), feat)           # Linear(512, 256)
    b1 = unif(ks[3], (1, hidden), feat)
    w2 = unif(ks[4], (hidden, num_classes), hidden)  # Linear(256, num_classes)
    b2 = unif(ks[5], (1, num_classes), hidden)
    return wp, bp, w1, b1, w2, b2


if __name__ == "__main__":
    key = jax.random.PRNGKey(0)
    k_x, k_p = jax.random.split(key)

    B, C, H, W = 2, 4, 16, 16
    num_classes = 10

    x = jax.random.normal(k_x, (B, C, H, W), jnp.float32)
    params = init_params(k_p, in_ch=C, feat=512, hidden=256, num_classes=num_classes)

    out = jax.block_until_ready(simclr_forward(x, params))

    assert out.shape == (B, num_classes), out.shape
    assert out.dtype == jnp.float32
    assert bool(jnp.all((out >= 0.0) & (out <= 1.0)))  # sigmoid range check

    # Sanity check against a pure-JAX reference of the same forward semantics
    # (catches pool-fold / flatten-order permutation bugs).
    wp, bp, w1, b1, w2, b2 = params
    feat = jnp.maximum(jnp.mean(x.reshape(B, C, H * W), axis=-1) @ wp + bp, 0.0)
    h = jnp.maximum(feat @ w1 + b1, 0.0)
    ref = jax.nn.sigmoid(h @ w2 + b2)
    assert bool(jnp.max(jnp.abs(out - ref)) < 5e-2)

    print("KERNEL_OK")
</pallas_src>

<mosaic_0001>
module attributes {stable_mosaic.version = 11 : i64} {
  func.func @simclr_kernel(%arg0: i32, %arg1: memref<8x1024xf32, #tpu.memory_space<vmem>>, %arg2: memref<1024x512xf32, #tpu.memory_space<vmem>>, %arg3: memref<1x512xf32, #tpu.memory_space<vmem>>, %arg4: memref<512x256xf32, #tpu.memory_space<vmem>>, %arg5: memref<1x256xf32, #tpu.memory_space<vmem>>, %arg6: memref<256x128xf32, #tpu.memory_space<vmem>>, %arg7: memref<1x128xf32, #tpu.memory_space<vmem>>, %arg8: memref<8x128xf32, #tpu.memory_space<vmem>>) attributes {dimension_semantics = [#tpu.dimension_semantics<parallel>], iteration_bounds = array<i64: 1>, scalar_prefetch = 0 : i64, scratch_operands = 0 : i64, tpu.core_type = #tpu.core_type<tc>, window_params = [{transform_indices = @transform_0, window_bounds = array<i64: 8, 1024>}, {pipeline_mode = #tpu.pipeline_mode<synchronous>, transform_indices = @transform_1, window_bounds = array<i64: 1024, 512>}, {pipeline_mode = #tpu.pipeline_mode<synchronous>, transform_indices = @transform_2, window_bounds = array<i64: 1, 512>}, {pipeline_mode = #tpu.pipeline_mode<synchronous>, transform_indices = @transform_3, window_bounds = array<i64: 512, 256>}, {pipeline_mode = #tpu.pipeline_mode<synchronous>, transform_indices = @transform_4, window_bounds = array<i64: 1, 256>}, {pipeline_mode = #tpu.pipeline_mode<synchronous>, transform_indices = @transform_5, window_bounds = array<i64: 256, 128>}, {pipeline_mode = #tpu.pipeline_mode<synchronous>, transform_indices = @transform_6, window_bounds = array<i64: 1, 128>}, {transform_indices = @transform_7, window_bounds = array<i64: 8, 128>}]} {
    %c0 = arith.constant 0 : index
    %c0_0 = arith.constant 0 : index
    %0 = vector.load %arg1[%c0, %c0_0] : memref<8x1024xf32, #tpu.memory_space<vmem>>, vector<8x1024xf32>
    %c0_1 = arith.constant 0 : index
    %c0_2 = arith.constant 0 : index
    %1 = vector.load %arg2[%c0_1, %c0_2] : memref<1024x512xf32, #tpu.memory_space<vmem>>, vector<1024x512xf32>
    %cst = arith.constant dense<0.000000e+00> : vector<8x512xf32>
    %2 = tpu.matmul %0, %1, %cst {dimension_numbers = #tpu.dot_dimension_numbers<[1], [0], [0], [1], [0, 0, 1, 1], [], []>} : vector<8x1024xf32>, vector<1024x512xf32>, vector<8x512xf32> -> vector<8x512xf32>
    %c0_3 = arith.constant 0 : index
    %c0_4 = arith.constant 0 : index
    %3 = vector.load %arg3[%c0_3, %c0_4] : memref<1x512xf32, #tpu.memory_space<vmem>>, vector<1x512xf32>
    %4 = vector.broadcast %3 : vector<1x512xf32> to vector<8x512xf32>
    %5 = arith.addf %2, %4 : vector<8x512xf32>
    %cst_5 = arith.constant 0.000000e+00 : f32
    %6 = vector.broadcast %cst_5 : f32 to vector<8x512xf32>
    %7 = arith.maximumf %5, %6 : vector<8x512xf32>
    %c0_6 = arith.constant 0 : index
    %c0_7 = arith.constant 0 : index
    %8 = vector.load %arg4[%c0_6, %c0_7] : memref<512x256xf32, #tpu.memory_space<vmem>>, vector<512x256xf32>
    %cst_8 = arith.constant dense<0.000000e+00> : vector<8x256xf32>
    %9 = tpu.matmul %7, %8, %cst_8 {dimension_numbers = #tpu.dot_dimension_numbers<[1], [0], [0], [1], [0, 0, 1, 1], [], []>} : vector<8x512xf32>, vector<512x256xf32>, vector<8x256xf32> -> vector<8x256xf32>
    %c0_9 = arith.constant 0 : index
    %c0_10 = arith.constant 0 : index
    %10 = vector.load %arg5[%c0_9, %c0_10] : memref<1x256xf32, #tpu.memory_space<vmem>>, vector<1x256xf32>
    %11 = vector.broadcast %10 : vector<1x256xf32> to vector<8x256xf32>
    %12 = arith.addf %9, %11 : vector<8x256xf32>
    %cst_11 = arith.constant 0.000000e+00 : f32
    %13 = vector.broadcast %cst_11 : f32 to vector<8x256xf32>
    %14 = arith.maximumf %12, %13 : vector<8x256xf32>
    %c0_12 = arith.constant 0 : index
    %c0_13 = arith.constant 0 : index
    %15 = vector.load %arg6[%c0_12, %c0_13] : memref<256x128xf32, #tpu.memory_space<vmem>>, vector<256x128xf32>
    %cst_14 = arith.constant dense<0.000000e+00> : vector<8x128xf32>
    %16 = tpu.matmul %14, %15, %cst_14 {dimension_numbers = #tpu.dot_dimension_numbers<[1], [0], [0], [1], [0, 0, 1, 1], [], []>} : vector<8x256xf32>, vector<256x128xf32>, vector<8x128xf32> -> vector<8x128xf32>
    %c0_15 = arith.constant 0 : index
    %c0_16 = arith.constant 0 : index
    %17 = vector.load %arg7[%c0_15, %c0_16] : memref<1x128xf32, #tpu.memory_space<vmem>>, vector<1x128xf32>
    %18 = vector.broadcast %17 : vector<1x128xf32> to vector<8x128xf32>
    %19 = arith.addf %16, %18 : vector<8x128xf32>
    %20 = arith.negf %19 : vector<8x128xf32>
    %21 = math.exp %20 : vector<8x128xf32>
    %cst_17 = arith.constant 1.000000e+00 : f32
    %22 = vector.broadcast %cst_17 : f32 to vector<8x128xf32>
    %23 = arith.addf %22, %21 : vector<8x128xf32>
    %24 = arith.divf %22, %23 : vector<8x128xf32>
    %c0_18 = arith.constant 0 : index
    %c0_19 = arith.constant 0 : index
    %25 = vector.load %arg8[%c0_18, %c0_19] : memref<8x128xf32, #tpu.memory_space<vmem>>, vector<8x128xf32>
    tpu.vector_store %arg8[%c0_18, %c0_19], %24 {strides = array<i32>} : memref<8x128xf32, #tpu.memory_space<vmem>>, vector<8x128xf32>,
    return
  }
  func.func @transform_0(%arg0: i32) -> (i32, i32) {
    %c0_i32 = arith.constant 0 : i32
    %c0_i32_0 = arith.constant 0 : i32
    return %arg0, %c0_i32 : i32, i32
  }
  func.func @transform_1(%arg0: i32) -> (i32, i32) {
    %c0_i32 = arith.constant 0 : i32
    %c0_i32_0 = arith.constant 0 : i32
    %c0_i32_1 = arith.constant 0 : i32
    return %c0_i32, %c0_i32_0 : i32, i32
  }
  func.func @transform_2(%arg0: i32) -> (i32, i32) {
    %c0_i32 = arith.constant 0 : i32
    %c0_i32_0 = arith.constant 0 : i32
    %c0_i32_1 = arith.constant 0 : i32
    return %c0_i32, %c0_i32_0 : i32, i32
  }
  func.func @transform_3(%arg0: i32) -> (i32, i32) {
    %c0_i32 = arith.constant 0 : i32
    %c0_i32_0 = arith.constant 0 : i32
    %c0_i32_1 = arith.constant 0 : i32
    return %c0_i32, %c0_i32_0 : i32, i32
  }
  func.func @transform_4(%arg0: i32) -> (i32, i32) {
    %c0_i32 = arith.constant 0 : i32
    %c0_i32_0 = arith.constant 0 : i32
    %c0_i32_1 = arith.constant 0 : i32
    return %c0_i32, %c0_i32_0 : i32, i32
  }
  func.func @transform_5(%arg0: i32) -> (i32, i32) {
    %c0_i32 = arith.constant 0 : i32
    %c0_i32_0 = arith.constant 0 : i32
    %c0_i32_1 = arith.constant 0 : i32
    return %c0_i32, %c0_i32_0 : i32, i32
  }
  func.func @transform_6(%arg0: i32) -> (i32, i32) {
    %c0_i32 = arith.constant 0 : i32
    %c0_i32_0 = arith.constant 0 : i32
    %c0_i32_1 = arith.constant 0 : i32
    return %c0_i32, %c0_i32_0 : i32, i32
  }
  func.func @transform_7(%arg0: i32) -> (i32, i32) {
    %c0_i32 = arith.constant 0 : i32
    %c0_i32_0 = arith.constant 0 : i32
    return %arg0, %c0_i32 : i32, i32
  }
}

</mosaic_0001>

<bundles_post_ra>
// kernel: tpu_custom_call.1
= control target key start
LH: loop header
LB: loop body
LE: loop exit
PB: predicated region body
PF: predicated region fallthrough
CT: control target
= control target key end

     0   :  { %12 = vsyncpa [#allocation3], 0  ;;  %s2784_s0 = inlined_call_operand.hbm [shape: f32[8,1024], index: 0, kind: input, shape index: {}]   ;;  %s2785_s1 = inlined_call_operand.hbm [shape: f32[1024,512], index: 1, kind: input, shape index: {}]   ;;  %s2786_s2 = inlined_call_operand.hbm [shape: f32[1,512], index: 2, kind: input, shape index: {}]   ;;  %s2787_s3 = inlined_call_operand.hbm [shape: f32[512,256], index: 3, kind: input, shape index: {}]   ;;  %s2788_s4 = inlined_call_operand.hbm [shape: f32[1,256], index: 4, kind: input, shape index: {}]   ;;  %s2789_s5 = inlined_call_operand.hbm [shape: f32[256,128], index: 5, kind: input, shape index: {}]   ;;  %s2790_s6 = inlined_call_operand.hbm [shape: f32[1,128], index: 6, kind: input, shape index: {}]   ;;  %s2791_s7 = inlined_call_operand.hbm [shape: f32[8,128], index: 7, kind: output, shape index: {}]  }
   0x1   :  { %13 = vsyncpa [#allocation6], 0 }
   0x2   :  { %14 = vsyncpa [#allocation9], 0 }
   0x3   :  { %15 = vsyncpa [#allocation12], 0 }
   0x4   :  { %16 = vsyncpa [#allocation4], 0  ;;  %s2580_s24 = smov [#allocation5]   ;;  %s2394_s28 = scalar_lea.hbm %s2785_s1, 65536 }
   0x5   :  { %s32_s25 = sshll.u32 %s2580_s24, 4  ;;  %p2395_p0 = scmp.ne.s32.totalorder %s2785_s1, %s2394_s28  ;;  %s33_s25 = int_to_ptr.vmem [resolvable:$true] %s32_s25 }
   0x6   :  { %p2398_p1 = scmp.lt.u32.totalorder %s2394_s28, %s2785_s1 }
   0x8   :  { %p2400_p2 = pnand %p2398_p1, %p2395_p0 }
   0xa   :  { %2403 = shalt.err (!%p2400_p2)
}
   0xb   :  { %s2404_s10 = scalar_lea.vmem %s33_s25, 65536  ;;  %p2409_p4 = scmp.lt.s32.totalorder %s33_s25, %s33_s25 }
   0xc   :  { %p2405_p3 = scmp.ne.s32.totalorder %s33_s25, %s2404_s10  ;;  %p2410_p5 = scmp.lt.s32.totalorder %s2404_s10, %s2404_s10 }
   0xe   :  { %p2411_p6 = por %p2410_p5, %p2409_p4 }
  0x10   :  { %p2412_p7 = pnand %p2411_p6, %p2405_p3 }
  0x12   :  { %2415 = shalt.err (!%p2412_p7)
}
  0x13   :  { %s2581_s11 = smov 512   ;;  %s2582_s12 = smov 32  }
  0x14   :  { %38 = dma.hbm_to_vmem [thread:$0]  %s2785_s1, 65536, %s33_s25, [#allocation6], %s2581_s11, %s2581_s11, %s2582_s12  }
  0x15   :  { %s2583_s15 = smov [#allocation8]   ;;  %s2416_s19 = scalar_lea.hbm %s2787_s3, 16384 }
  0x16   :  { %s54_s16 = sshll.u32 %s2583_s15, 4  ;;  %p2417_p8 = scmp.ne.s32.totalorder %s2787_s3, %s2416_s19  ;;  %s55_s16 = int_to_ptr.vmem [resolvable:$true] %s54_s16 }
  0x17   :  { %p2420_p9 = scmp.lt.u32.totalorder %s2416_s19, %s2787_s3 }
  0x19   :  { %p2422_p10 = pnand %p2420_p9, %p2417_p8 }
  0x1b   :  { %2425 = shalt.err (!%p2422_p10)
}
  0x1c   :  { %s2426_s24 = scalar_lea.vmem %s55_s16, 16384  ;;  %p2431_p12 = scmp.lt.s32.totalorder %s55_s16, %s55_s16 }
  0x1d   :  { %p2427_p11 = scmp.ne.s32.totalorder %s55_s16, %s2426_s24  ;;  %p2432_p13 = scmp.lt.s32.totalorder %s2426_s24, %s2426_s24 }
  0x1f   :  { %p2433_p0 = por %p2432_p13, %p2431_p12 }
  0x21   :  { %p2434_p1 = pnand %p2433_p0, %p2427_p11 }
  0x23   :  { %2437 = shalt.err (!%p2434_p1)
}
  0x24   :  { %s2584_s1 = smov 256   ;;  %s2585_s25 = smov 16  }
  0x25   :  { %60 = dma.hbm_to_vmem [thread:$0]  %s2787_s3, 16384, %s55_s16, [#allocation9], %s2584_s1, %s2584_s1, %s2585_s25  }
  0x26   :  { %s2586_s28 = smov [#allocation11]   ;;  %s2438_s9 = scalar_lea.hbm %s2789_s5, 4096 }
  0x27   :  { %s76_s29 = sshll.u32 %s2586_s28, 4  ;;  %p2439_p2 = scmp.ne.s32.totalorder %s2789_s5, %s2438_s9  ;;  %s77_s29 = int_to_ptr.vmem [resolvable:$true] %s76_s29 }
  0x28   :  { %p2442_p3 = scmp.lt.u32.totalorder %s2438_s9, %s2789_s5 }
  0x2a   :  { %p2444_p4 = pnand %p2442_p3, %p2439_p2 }
  0x2c   :  { %2447 = shalt.err (!%p2444_p4)
}
  0x2d   :  { %s2448_s14 = scalar_lea.vmem %s77_s29, 4096  ;;  %p2453_p6 = scmp.lt.s32.totalorder %s77_s29, %s77_s29 }
  0x2e   :  { %p2449_p5 = scmp.ne.s32.totalorder %s77_s29, %s2448_s14  ;;  %p2454_p7 = scmp.lt.s32.totalorder %s2448_s14, %s2448_s14 }
  0x30   :  { %p2455_p8 = por %p2454_p7, %p2453_p6 }
  0x32   :  { %p2456_p9 = pnand %p2455_p8, %p2449_p5 }
  0x34   :  { %2459 = shalt.err (!%p2456_p9)
}
  0x35   :  { %s2587_s3 = smov 128   ;;  %s2588_s15 = smov 8  }
  0x36   :  { %82 = dma.hbm_to_vmem [thread:$0]  %s2789_s5, 4096, %s77_s29, [#allocation12], %s2587_s3, %s2587_s3, %s2588_s15  }
  0x37   :  { %s2589_s18 = smov [#allocation2]   ;;  %s2590_s20 = smov [#allocation7]  }
  0x38   :  { %s23_s19 = sshll.u32 %s2589_s18, 4  ;;  %s45_s21 = sshll.u32 %s2590_s20, 4  ;;  %s24_s19 = int_to_ptr.vmem [resolvable:$true] %s23_s19  ;;  %s46_s21 = int_to_ptr.vmem [resolvable:$true] %s45_s21 }
  0x39   :  { %s2460_s24 = scalar_lea.hbm %s2784_s0, 1024 }
  0x3a   :  { %p2461_p10 = scmp.ne.s32.totalorder %s2784_s0, %s2460_s24  ;;  %p2464_p11 = scmp.lt.u32.totalorder %s2460_s24, %s2784_s0 }
  0x3c   :  { %p2466_p12 = pnand %p2464_p11, %p2461_p10 }
  0x3e   :  { %2469 = shalt.err (!%p2466_p12)
}
  0x3f   :  { %s2470_s5 = scalar_lea.vmem %s24_s19, 1024  ;;  %p2475_p0 = scmp.lt.s32.totalorder %s24_s19, %s24_s19 }
  0x40   :  { %p2471_p13 = scmp.ne.s32.totalorder %s24_s19, %s2470_s5  ;;  %p2476_p1 = scmp.lt.s32.totalorder %s2470_s5, %s2470_s5 }
  0x42   :  { %p2477_p2 = por %p2476_p1, %p2475_p0 }
  0x44   :  { %p2478_p3 = pnand %p2477_p2, %p2471_p13 }
  0x46   :  { %2481 = shalt.err (!%p2478_p3)
}
  0x47   :  { %26 = dma.hbm_to_vmem [thread:$0]  %s2784_s0, 1024, %s24_s19, [#allocation3]  }
  0x48   :  { %s2482_s9 = scalar_lea.hbm %s2786_s2, 64 }
  0x49   :  { %p2483_p4 = scmp.ne.s32.totalorder %s2786_s2, %s2482_s9  ;;  %p2486_p5 = scmp.lt.u32.totalorder %s2482_s9, %s2786_s2 }
  0x4b   :  { %p2488_p6 = pnand %p2486_p5, %p2483_p4 }
  0x4d   :  { %2491 = shalt.err (!%p2488_p6)
}
  0x4e   :  { %s2492_s14 = scalar_lea.vmem %s46_s21, 64  ;;  %p2497_p8 = scmp.lt.s32.totalorder %s46_s21, %s46_s21 }
  0x4f   :  { %p2493_p7 = scmp.ne.s32.totalorder %s46_s21, %s2492_s14  ;;  %p2498_p9 = scmp.lt.s32.totalorder %s2492_s14, %s2492_s14 }
  0x51   :  { %p2499_p10 = por %p2498_p9, %p2497_p8 }
  0x53   :  { %p2500_p11 = pnand %p2499_p10, %p2493_p7 }
  0x55   :  { %2503 = shalt.err (!%p2500_p11)
}
  0x56   :  { %48 = dma.hbm_to_vmem [thread:$0]  %s2786_s2, 64, %s46_s21, [#allocation6]  }
  0x57   :  { %s2591_s15 = smov [#allocation10]   ;;  %s2592_s17 = smov [#allocation13]  }
  0x58   :  { %s67_s16 = sshll.u32 %s2591_s15, 4  ;;  %s89_s18 = sshll.u32 %s2592_s17, 4  ;;  %s68_s16 = int_to_ptr.vmem [resolvable:$true] %s67_s16  ;;  %s90_s18 = int_to_ptr.vmem [resolvable:$true] %s89_s18 }
  0x59   :  { %s2504_s22 = scalar_lea.hbm %s2788_s4, 32 }
  0x5a   :  { %p2505_p12 = scmp.ne.s32.totalorder %s2788_s4, %s2504_s22  ;;  %p2508_p13 = scmp.lt.u32.totalorder %s2504_s22, %s2788_s4 }
  0x5c   :  { %p2510_p0 = pnand %p2508_p13, %p2505_p12 }
  0x5e   :  { %2513 = shalt.err (!%p2510_p0)
}
  0x5f   :  { %s2514_s2 = scalar_lea.vmem %s68_s16, 32  ;;  %p2519_p2 = scmp.lt.s32.totalorder %s68_s16, %s68_s16 }
  0x60   :  { %p2515_p1 = scmp.ne.s32.totalorder %s68_s16, %s2514_s2  ;;  %p2520_p3 = scmp.lt.s32.totalorder %s2514_s2, %s2514_s2 }
  0x62   :  { %p2521_p4 = por %p2520_p3, %p2519_p2 }
  0x64   :  { %p2522_p5 = pnand %p2521_p4, %p2515_p1 }
  0x66   :  { %2525 = shalt.err (!%p2522_p5)
}
  0x67   :  { %70 = dma.hbm_to_vmem [thread:$0]  %s2788_s4, 32, %s68_s16, [#allocation9]  }
  0x68   :  { %s2526_s28 = scalar_lea.hbm %s2790_s6, 16 }
  0x69   :  { %p2527_p6 = scmp.ne.s32.totalorder %s2790_s6, %s2526_s28  ;;  %p2530_p7 = scmp.lt.u32.totalorder %s2526_s28, %s2790_s6 }
  0x6b   :  { %p2532_p8 = pnand %p2530_p7, %p2527_p6 }
  0x6d   :  { %2535 = shalt.err (!%p2532_p8)
}
  0x6e   :  { %s2536_s10 = scalar_lea.vmem %s90_s18, 16  ;;  %s2540_s11 = scalar_lea.vmem %s90_s18, 32 }
  0x6f   :  { %p2537_p9 = scmp.ne.s32.totalorder %s90_s18, %s2536_s10  ;;  %p2541_p10 = scmp.lt.s32.totalorder %s90_s18, %s90_s18 }
  0x70   :  { %p2542_p11 = scmp.lt.s32.totalorder %s2540_s11, %s2536_s10 }
  0x72   :  { %p2543_p12 = por %p2542_p11, %p2541_p10 }
  0x74   :  { %p2544_p13 = pnand %p2543_p12, %p2537_p9 }
  0x76   :  { %2547 = shalt.err (!%p2544_p13)
}
  0x77   :  { %92 = dma.hbm_to_vmem [thread:$0]  %s2790_s6, 16, %s90_s18, [#allocation12]  }
  0x78   :  { %2570 = dma.done.wait [#allocation3], 1024  }
  0x79   :  { %2571 = vsyncadd [#allocation3], 4294966272 }
  0x7a   :  { %2572 = dma.done.wait [#allocation6], 65600  }
  0x7b   :  { %2573 = vsyncadd [#allocation6], 4294901696 }
  0x7c   :  { %2574 = dma.done.wait [#allocation9], 16416  }
  0x7d   :  { %2575 = vsyncadd [#allocation9], 4294950880 }
  0x7e   :  { %2576 = dma.done.wait [#allocation12], 4112  }
  0x7f   :  { %2577 = vsyncadd [#allocation12], 4294963184  ;;  %v123_v0 = vld [vmem:[#allocation5 + $0x8] sm:$0xff]  ;;  %v122_v5 = vld [vmem:[#allocation5] sm:$0xff]  ;;  %s2593_s6 = smov [#allocation14]  }
  0x80   :  { %v127_v1 = vld [vmem:[#allocation5 + $0x28] sm:$0xff]  ;;  %v126_v6 = vld [vmem:[#allocation5 + $0x20] sm:$0xff]  ;;  %s1634_s13 = sshll.u32 %s2593_s6, 4  ;;  %s1635_s13 = int_to_ptr.vmem [resolvable:$true] %s1634_s13 }
  0x81   :  { %v251_v2 = vld [vmem:[#allocation5 + $0x408] sm:$0xff]  ;;  %v1683_v3 = vpack.c.bf16 %v127_v1, %v123_v0  ;;  %v1685_v8 = vpack.c.bf16 %v126_v6, %v122_v5  ;;  %v250_v9 = vld [vmem:[#allocation5 + $0x400] sm:$0xff]  ;;  %s2548_s14 = scalar_lea.vmem %s1635_s13, 128  ;;  %p2553_p1 = scmp.lt.s32.totalorder %s1635_s13, %s1635_s13 }
  0x82   :  { %v255_v4 = vld [vmem:[#allocation5 + $0x428] sm:$0xff]  ;;  %v254_v10 = vld [vmem:[#allocation5 + $0x420] sm:$0xff]  ;;  %p2549_p0 = scmp.ne.s32.totalorder %s1635_s13, %s2548_s14  ;;  %p2554_p2 = scmp.lt.s32.totalorder %s2548_s14, %s2548_s14 }
  0x83   :  { %v1747_v7 = vpack.c.bf16 %v255_v4, %v251_v2  ;;  %v131_v11 = vld [vmem:[#allocation5 + $0x48] sm:$0xff]  ;;  %1684 = vmatprep.subr.bf16.mxu1 %v1683_v3  ;;  %v1749_v12 = vpack.c.bf16 %v254_v10, %v250_v9  ;;  %v130_v18 = vld [vmem:[#allocation5 + $0x40] sm:$0xff] }
  0x84   :  { %v135_v13 = vld [vmem:[#allocation5 + $0x68] sm:$0xff]  ;;  %1686 = vmatpush1.bf16.msra.mxu1 %v1685_v8  ;;  %v134_v19 = vld [vmem:[#allocation5 + $0x60] sm:$0xff]  ;;  %p2555_p3 = por %p2554_p2, %p2553_p1 }
  0x85   :  { %v259_v14 = vld [vmem:[#allocation5 + $0x448] sm:$0xff]  ;;  %1748 = vmatprep.subr.bf16.mxu0 %v1747_v7  ;;  %v1687_v16 = vpack.c.bf16 %v135_v13, %v131_v11  ;;  %v258_v20 = vld [vmem:[#allocation5 + $0x440] sm:$0xff]  ;;  %v1689_v21 = vpack.c.bf16 %v134_v19, %v130_v18 }
  0x86   :  { %v263_v15 = vld [vmem:[#allocation5 + $0x468] sm:$0xff]  ;;  %1750 = vmatpush1.bf16.msra.mxu0 %v1749_v12  ;;  %v262_v22 = vld [vmem:[#allocation5 + $0x460] sm:$0xff]  ;;  %p2556_p4 = pnand %p2555_p3, %p2549_p0 }
  0x87   :  { %v1751_v17 = vpack.c.bf16 %v263_v15, %v259_v14  ;;  %v139_v23 = vld [vmem:[#allocation5 + $0x88] sm:$0xff]  ;;  %1688 = vmatprep.subr.bf16.mxu1 %v1687_v16  ;;  %v1753_v25 = vpack.c.bf16 %v262_v22, %v258_v20  ;;  %v138_v29 = vld [vmem:[#allocation5 + $0x80] sm:$0xff] }
  0x88   :  { %v143_v24 = vld [vmem:[#allocation5 + $0xa8] sm:$0xff]  ;;  %v142_v31 = vld [vmem:[#allocation5 + $0xa0] sm:$0xff]  ;;  %1690 = vmatpush1.bf16.msra.mxu1 %v1689_v21 }
  0x89   :  { %1752 = vmatprep.subr.bf16.mxu0 %v1751_v17  ;;  %v1691_v26 = vpack.c.bf16 %v143_v24, %v139_v23  ;;  %v267_v27 = vld [vmem:[#allocation5 + $0x488] sm:$0xff]  ;;  %v266_v32 = vld [vmem:[#allocation5 + $0x480] sm:$0xff]  ;;  %v1693_v34 = vpack.c.bf16 %v142_v31, %v138_v29 }
  0x8a   :  { %v271_v28 = vld [vmem:[#allocation5 + $0x4a8] sm:$0xff]  ;;  %v270_v33 = vld [vmem:[#allocation5 + $0x4a0] sm:$0xff]  ;;  %1754 = vmatpush1.bf16.msra.mxu0 %v1753_v25 }
  0x8b   :  { %v1755_v30 = vpack.c.bf16 %v271_v28, %v267_v27  ;;  %v147_v35 = vld [vmem:[#allocation5 + $0xc8] sm:$0xff]  ;;  %1692 = vmatprep.subr.bf16.mxu1 %v1691_v26  ;;  %v1757_v38 = vpack.c.bf16 %v270_v33, %v266_v32  ;;  %v146_v41 = vld [vmem:[#allocation5 + $0xc0] sm:$0xff] }
  0x8c   :  { %v151_v36 = vld [vmem:[#allocation5 + $0xe8] sm:$0xff]  ;;  %v150_v42 = vld [vmem:[#allocation5 + $0xe0] sm:$0xff]  ;;  %1694 = vmatpush1.bf16.msra.mxu1 %v1693_v34 }
  0x8d   :  { %v275_v37 = vld [vmem:[#allocation5 + $0x4c8] sm:$0xff]  ;;  %v1695_v39 = vpack.c.bf16 %v151_v36, %v147_v35  ;;  %1756 = vmatprep.subr.bf16.mxu0 %v1755_v30  ;;  %v274_v44 = vld [vmem:[#allocation5 + $0x4c0] sm:$0xff]  ;;  %v1697_v50 = vpack.c.bf16 %v150_v42, %v146_v41 }
  0x8e   :  { %v279_v40 = vld [vmem:[#allocation5 + $0x4e8] sm:$0xff]  ;;  %v278_v45 = vld [vmem:[#allocation5 + $0x4e0] sm:$0xff]  ;;  %1758 = vmatpush1.bf16.msra.mxu0 %v1757_v38 }
  0x8f   :  { %v1759_v43 = vpack.c.bf16 %v279_v40, %v275_v37  ;;  %v155_v46 = vld [vmem:[#allocation5 + $0x108] sm:$0xff]  ;;  %1696 = vmatprep.subr.bf16.mxu1 %v1695_v39  ;;  %v1761_v51 = vpack.c.bf16 %v278_v45, %v274_v44  ;;  %v154_v53 = vld [vmem:[#allocation5 + $0x100] sm:$0xff] }
  0x90   :  { %v159_v47 = vld [vmem:[#allocation5 + $0x128] sm:$0xff]  ;;  %v158_v54 = vld [vmem:[#allocation5 + $0x120] sm:$0xff]  ;;  %1698 = vmatpush1.bf16.msra.mxu1 %v1697_v50 }
  0x91   :  { %v283_v48 = vld [vmem:[#allocation5 + $0x508] sm:$0xff]  ;;  %v1699_v52 = vpack.c.bf16 %v159_v47, %v155_v46  ;;  %v282_v55 = vld [vmem:[#allocation5 + $0x500] sm:$0xff]  ;;  %1760 = vmatprep.subr.bf16.mxu0 %v1759_v43  ;;  %v1701_v62 = vpack.c.bf16 %v158_v54, %v154_v53 }
  0x92   :  { %v287_v49 = vld [vmem:[#allocation5 + $0x528] sm:$0xff]  ;;  %v286_v57 = vld [vmem:[#allocation5 + $0x520] sm:$0xff]  ;;  %1762 = vmatpush1.bf16.msra.mxu0 %v1761_v51 }
  0x93   :  { %v1763_v56 = vpack.c.bf16 %v287_v49, %v283_v48  ;;  %v163_v58 = vld [vmem:[#allocation5 + $0x148] sm:$0xff]  ;;  %1700 = vmatprep.subr.bf16.mxu1 %v1699_v52  ;;  %v1765_v63 = vpack.c.bf16 %v286_v57, %v282_v55  ;;  %v162_v1 = vld [vmem:[#allocation5 + $0x140] sm:$0xff] }
  0x94   :  { %v167_v59 = vld [vmem:[#allocation5 + $0x168] sm:$0xff]  ;;  %v166_v2 = vld [vmem:[#allocation5 + $0x160] sm:$0xff]  ;;  %1702 = vmatpush1.bf16.msra.mxu1 %v1701_v62 }
  0x95   :  { %v291_v60 = vld [vmem:[#allocation5 + $0x548] sm:$0xff]  ;;  %v1703_v0 = vpack.c.bf16 %v167_v59, %v163_v58  ;;  %v290_v3 = vld [vmem:[#allocation5 + $0x540] sm:$0xff]  ;;  %1764 = vmatprep.subr.bf16.mxu0 %v1763_v56  ;;  %v1705_v10 = vpack.c.bf16 %v166_v2, %v162_v1 }
  0x96   :  { %v295_v61 = vld [vmem:[#allocation5 + $0x568] sm:$0xff]  ;;  %v294_v5 = vld [vmem:[#allocation5 + $0x560] sm:$0xff]  ;;  %1766 = vmatpush1.bf16.msra.mxu0 %v1765_v63 }
  0x97   :  { %v1767_v4 = vpack.c.bf16 %v295_v61, %v291_v60  ;;  %v171_v6 = vld [vmem:[#allocation5 + $0x188] sm:$0xff]  ;;  %1704 = vmatprep.subr.bf16.mxu1 %v1703_v0  ;;  %v1769_v11 = vpack.c.bf16 %v294_v5, %v290_v3  ;;  %v170_v13 = vld [vmem:[#allocation5 + $0x180] sm:$0xff] }
  0x98   :  { %v175_v7 = vld [vmem:[#allocation5 + $0x1a8] sm:$0xff]  ;;  %v174_v14 = vld [vmem:[#allocation5 + $0x1a0] sm:$0xff]  ;;  %1706 = vmatpush1.bf16.msra.mxu1 %v1705_v10 }
  0x99   :  { %v299_v8 = vld [vmem:[#allocation5 + $0x588] sm:$0xff]  ;;  %v1707_v12 = vpack.c.bf16 %v175_v7, %v171_v6  ;;  %v298_v15 = vld [vmem:[#allocation5 + $0x580] sm:$0xff]  ;;  %1768 = vmatprep.subr.bf16.mxu0 %v1767_v4  ;;  %v1709_v22 = vpack.c.bf16 %v174_v14, %v170_v13 }
  0x9a   :  { %v303_v9 = vld [vmem:[#allocation5 + $0x5a8] sm:$0xff]  ;;  %v302_v17 = vld [vmem:[#allocation5 + $0x5a0] sm:$0xff]  ;;  %1770 = vmatpush1.bf16.msra.mxu0 %v1769_v11 }
  0x9b   :  { %v1771_v16 = vpack.c.bf16 %v303_v9, %v299_v8  ;;  %v179_v18 = vld [vmem:[#allocation5 + $0x1c8] sm:$0xff]  ;;  %1708 = vmatprep.subr.bf16.mxu1 %v1707_v12  ;;  %v1773_v23 = vpack.c.bf16 %v302_v17, %v298_v15  ;;  %v178_v25 = vld [vmem:[#allocation5 + $0x1c0] sm:$0xff] }
  0x9c   :  { %v183_v19 = vld [vmem:[#allocation5 + $0x1e8] sm:$0xff]  ;;  %v182_v26 = vld [vmem:[#allocation5 + $0x1e0] sm:$0xff]  ;;  %1710 = vmatpush1.bf16.msra.mxu1 %v1709_v22 }
  0x9d   :  { %v307_v20 = vld [vmem:[#allocation5 + $0x5c8] sm:$0xff]  ;;  %v1711_v24 = vpack.c.bf16 %v183_v19, %v179_v18  ;;  %v306_v27 = vld [vmem:[#allocation5 + $0x5c0] sm:$0xff]  ;;  %1772 = vmatprep.subr.bf16.mxu0 %v1771_v16  ;;  %v1713_v34 = vpack.c.bf16 %v182_v26, %v178_v25  ;;  %v2721_v19 = vld [vmem:[#allocation2 + $0x18] sm:$0xff] }
  0x9e   :  { %v311_v21 = vld [vmem:[#allocation5 + $0x5e8] sm:$0xff]  ;;  %v310_v29 = vld [vmem:[#allocation5 + $0x5e0] sm:$0xff]  ;;  %1774 = vmatpush1.bf16.msra.mxu0 %v1773_v23  ;;  %791 = vmatprep.mubr.f32.mxu0 %v2721_v19 }
  0x9f   :  { %v1775_v28 = vpack.c.bf16 %v311_v21, %v307_v20  ;;  %v187_v30 = vld [vmem:[#allocation5 + $0x208] sm:$0xff]  ;;  %1712 = vmatprep.subr.bf16.mxu1 %v1711_v24  ;;  %v1777_v35 = vpack.c.bf16 %v310_v29, %v306_v27  ;;  %v186_v37 = vld [vmem:[#allocation5 + $0x200] sm:$0xff] }
  0xa0   :  { %v191_v31 = vld [vmem:[#allocation5 + $0x228] sm:$0xff]  ;;  %v190_v38 = vld [vmem:[#allocation5 + $0x220] sm:$0xff]  ;;  %1714 = vmatpush1.bf16.msra.mxu1 %v1713_v34 }
  0xa1   :  { %v315_v32 = vld [vmem:[#allocation5 + $0x608] sm:$0xff]  ;;  %v1715_v36 = vpack.c.bf16 %v191_v31, %v187_v30  ;;  %v314_v39 = vld [vmem:[#allocation5 + $0x600] sm:$0xff]  ;;  %1776 = vmatprep.subr.bf16.mxu0 %v1775_v28  ;;  %v1717_v46 = vpack.c.bf16 %v190_v38, %v186_v37 }
  0xa2   :  { %v319_v33 = vld [vmem:[#allocation5 + $0x628] sm:$0xff]  ;;  %v318_v41 = vld [vmem:[#allocation5 + $0x620] sm:$0xff]  ;;  %1778 = vmatpush1.bf16.msra.mxu0 %v1777_v35 }
  0xa3   :  { %v1779_v40 = vpack.c.bf16 %v319_v33, %v315_v32  ;;  %v195_v42 = vld [vmem:[#allocation5 + $0x248] sm:$0xff]  ;;  %1716 = vmatprep.subr.bf16.mxu1 %v1715_v36  ;;  %v1781_v47 = vpack.c.bf16 %v318_v41, %v314_v39  ;;  %v194_v49 = vld [vmem:[#allocation5 + $0x240] sm:$0xff] }
  0xa4   :  { %v199_v43 = vld [vmem:[#allocation5 + $0x268] sm:$0xff]  ;;  %v198_v50 = vld [vmem:[#allocation5 + $0x260] sm:$0xff]  ;;  %1718 = vmatpush1.bf16.msra.mxu1 %v1717_v46 }
  0xa5   :  { %v323_v44 = vld [vmem:[#allocation5 + $0x648] sm:$0xff]  ;;  %v1719_v48 = vpack.c.bf16 %v199_v43, %v195_v42  ;;  %v322_v51 = vld [vmem:[#allocation5 + $0x640] sm:$0xff]  ;;  %1780 = vmatprep.subr.bf16.mxu0 %v1779_v40  ;;  %v1721_v58 = vpack.c.bf16 %v198_v50, %v194_v49 }
  0xa6   :  { %v327_v45 = vld [vmem:[#allocation5 + $0x668] sm:$0xff]  ;;  %v326_v53 = vld [vmem:[#allocation5 + $0x660] sm:$0xff]  ;;  %1782 = vmatpush1.bf16.msra.mxu0 %v1781_v47 }
  0xa7   :  { %v1783_v52 = vpack.c.bf16 %v327_v45, %v323_v44  ;;  %v203_v54 = vld [vmem:[#allocation5 + $0x288] sm:$0xff]  ;;  %1720 = vmatprep.subr.bf16.mxu1 %v1719_v48  ;;  %v1785_v59 = vpack.c.bf16 %v326_v53, %v322_v51  ;;  %v202_v61 = vld [vmem:[#allocation5 + $0x280] sm:$0xff] }
  0xa8   :  { %v207_v55 = vld [vmem:[#allocation5 + $0x2a8] sm:$0xff]  ;;  %v206_v62 = vld [vmem:[#allocation5 + $0x2a0] sm:$0xff]  ;;  %1722 = vmatpush1.bf16.msra.mxu1 %v1721_v58 }
  0xa9   :  { %v331_v56 = vld [vmem:[#allocation5 + $0x688] sm:$0xff]  ;;  %v1723_v60 = vpack.c.bf16 %v207_v55, %v203_v54  ;;  %v330_v63 = vld [vmem:[#allocation5 + $0x680] sm:$0xff]  ;;  %1784 = vmatprep.subr.bf16.mxu0 %v1783_v52  ;;  %v1725_v6 = vpack.c.bf16 %v206_v62, %v202_v61 }
  0xaa   :  { %v335_v57 = vld [vmem:[#allocation5 + $0x6a8] sm:$0xff]  ;;  %v334_v1 = vld [vmem:[#allocation5 + $0x6a0] sm:$0xff]  ;;  %1786 = vmatpush1.bf16.msra.mxu0 %v1785_v59 }
  0xab   :  { %v1787_v0 = vpack.c.bf16 %v335_v57, %v331_v56  ;;  %v211_v2 = vld [vmem:[#allocation5 + $0x2c8] sm:$0xff]  ;;  %v210_v7 = vld [vmem:[#allocation5 + $0x2c0] sm:$0xff]  ;;  %1724 = vmatprep.subr.bf16.mxu1 %v1723_v60  ;;  %v1789_v8 = vpack.c.bf16 %v334_v1, %v330_v63  ;;  %v129_v1 = vld [vmem:[#allocation5 + $0x38] sm:$0xff] }
  0xac   :  { %v215_v3 = vld [vmem:[#allocation5 + $0x2e8] sm:$0xff]  ;;  %v214_v10 = vld [vmem:[#allocation5 + $0x2e0] sm:$0xff]  ;;  %1726 = vmatpush1.bf16.msra.mxu1 %v1725_v6 }
  0xad   :  { %v339_v4 = vld [vmem:[#allocation5 + $0x6c8] sm:$0xff]  ;;  %v1727_v9 = vpack.c.bf16 %v215_v3, %v211_v2  ;;  %v338_v11 = vld [vmem:[#allocation5 + $0x6c0] sm:$0xff]  ;;  %1788 = vmatprep.subr.bf16.mxu0 %v1787_v0  ;;  %v1729_v20 = vpack.c.bf16 %v214_v10, %v210_v7  ;;  %v125_v0 = vld [vmem:[#allocation5 + $0x18] sm:$0xff] }
  0xae   :  { %v343_v5 = vld [vmem:[#allocation5 + $0x6e8] sm:$0xff]  ;;  %v342_v12 = vld [vmem:[#allocation5 + $0x6e0] sm:$0xff]  ;;  %1790 = vmatpush1.bf16.msra.mxu0 %v1789_v8  ;;  %v1939_v6 = vpack.c.bf16 %v129_v1, %v125_v0  ;;  %v124_v8 = vld [vmem:[#allocation5 + $0x10] sm:$0xff] }
  0xaf   :  { %v1791_v13 = vpack.c.bf16 %v343_v5, %v339_v4  ;;  %v219_v14 = vld [vmem:[#allocation5 + $0x308] sm:$0xff]  ;;  %1728 = vmatprep.subr.bf16.mxu1 %v1727_v9  ;;  %v1793_v21 = vpack.c.bf16 %v342_v12, %v338_v11  ;;  %v218_v23 = vld [vmem:[#allocation5 + $0x300] sm:$0xff]  ;;  %v128_v9 = vld [vmem:[#allocation5 + $0x30] sm:$0xff] }
  0xb0   :  { %v223_v15 = vld [vmem:[#allocation5 + $0x328] sm:$0xff]  ;;  %v222_v24 = vld [vmem:[#allocation5 + $0x320] sm:$0xff]  ;;  %1730 = vmatpush1.bf16.msra.mxu1 %v1729_v20  ;;  %v133_v12 = vld [vmem:[#allocation5 + $0x58] sm:$0xff]  ;;  %v1941_v20 = vpack.c.bf16 %v128_v9, %v124_v8 }
  0xb1   :  { %v2718_v16 = vld [vmem:[#allocation2 + $0x8] sm:$0xff]  ;;  %v1731_v22 = vpack.c.bf16 %v223_v15, %v219_v14  ;;  %v346_v25 = vld [vmem:[#allocation5 + $0x700] sm:$0xff]  ;;  %1792 = vmatprep.subr.bf16.mxu0 %v1791_v13  ;;  %v1733_v32 = vpack.c.bf16 %v222_v24, %v218_v23  ;;  %v137_v13 = vld [vmem:[#allocation5 + $0x78] sm:$0xff] }
  0xb2   :  { %v347_v17 = vld [vmem:[#allocation5 + $0x708] sm:$0xff]  ;;  %720 = vmatprep.mubr.f32.mxu1 %v2718_v16  ;;  %v350_v27 = vld [vmem:[#allocation5 + $0x720] sm:$0xff]  ;;  %1794 = vmatpush1.bf16.msra.mxu0 %v1793_v21  ;;  %v132_v24 = vld [vmem:[#allocation5 + $0x50] sm:$0xff] }
  0xb3   :  { %v351_v18 = vld [vmem:[#allocation5 + $0x728] sm:$0xff]  ;;  %1732 = vmatprep.subr.bf16.mxu1 %v1731_v22  ;;  %v1797_v33 = vpack.c.bf16 %v350_v27, %v346_v25  ;;  %v226_v35 = vld [vmem:[#allocation5 + $0x340] sm:$0xff]  ;;  %v1943_v22 = vpack.c.bf16 %v137_v13, %v133_v12  ;;  %v136_v25 = vld [vmem:[#allocation5 + $0x70] sm:$0xff] }
  0xb4   :  { %v1795_v26 = vpack.c.bf16 %v351_v18, %v347_v17  ;;  %v227_v28 = vld [vmem:[#allocation5 + $0x348] sm:$0xff]  ;;  %v230_v36 = vld [vmem:[#allocation5 + $0x360] sm:$0xff]  ;;  %1734 = vmatpush1.bf16.msra.mxu1 %v1733_v32  ;;  %v116_v18 = vld [vmem:[#allocation2 + $0x10] sm:$0xff]  ;;  %v1945_v32 = vpack.c.bf16 %v136_v25, %v132_v24 }
  0xb5   :  { %v231_v29 = vld [vmem:[#allocation5 + $0x368] sm:$0xff]  ;;  %v354_v37 = vld [vmem:[#allocation5 + $0x740] sm:$0xff]  ;;  %v1737_v44 = vpack.c.bf16 %v230_v36, %v226_v35  ;;  %v140_v36 = vld [vmem:[#allocation5 + $0x90] sm:$0xff] }
  0xb6   :  { %v355_v30 = vld [vmem:[#allocation5 + $0x748] sm:$0xff]  ;;  %v1735_v34 = vpack.c.bf16 %v231_v29, %v227_v28  ;;  %1796 = vmatprep.subr.bf16.mxu0 %v1795_v26  ;;  %v358_v39 = vld [vmem:[#allocation5 + $0x760] sm:$0xff]  ;;  %v141_v28 = vld [vmem:[#allocation5 + $0x98] sm:$0xff] }
  0xb7   :  { %v359_v31 = vld [vmem:[#allocation5 + $0x768] sm:$0xff]  ;;  %1798 = vmatpush1.bf16.msra.mxu0 %v1797_v33  ;;  %v1801_v45 = vpack.c.bf16 %v358_v39, %v354_v37  ;;  %v234_v47 = vld [vmem:[#allocation5 + $0x380] sm:$0xff]  ;;  %v145_v29 = vld [vmem:[#allocation5 + $0xb8] sm:$0xff] }
  0xb8   :  { %v1799_v38 = vpack.c.bf16 %v359_v31, %v355_v30  ;;  %v235_v40 = vld [vmem:[#allocation5 + $0x388] sm:$0xff]  ;;  %1736 = vmatprep.subr.bf16.mxu1 %v1735_v34  ;;  %v238_v48 = vld [vmem:[#allocation5 + $0x3a0] sm:$0xff]  ;;  %v1947_v34 = vpack.c.bf16 %v145_v29, %v141_v28  ;;  %v144_v37 = vld [vmem:[#allocation5 + $0xb0] sm:$0xff] }
  0xb9   :  { %v239_v41 = vld [vmem:[#allocation5 + $0x3a8] sm:$0xff]  ;;  %v362_v49 = vld [vmem:[#allocation5 + $0x780] sm:$0xff]  ;;  %1738 = vmatpush1.bf16.msra.mxu1 %v1737_v44  ;;  %v1741_v56 = vpack.c.bf16 %v238_v48, %v234_v47  ;;  %v1949_v44 = vpack.c.bf16 %v144_v37, %v140_v36  ;;  %v148_v48 = vld [vmem:[#allocation5 + $0xd0] sm:$0xff] }
  0xba   :  { %v363_v42 = vld [vmem:[#allocation5 + $0x788] sm:$0xff]  ;;  %v1739_v46 = vpack.c.bf16 %v239_v41, %v235_v40  ;;  %1800 = vmatprep.subr.bf16.mxu0 %v1799_v38  ;;  %v366_v51 = vld [vmem:[#allocation5 + $0x7a0] sm:$0xff]  ;;  %v149_v40 = vld [vmem:[#allocation5 + $0xd8] sm:$0xff] }
  0xbb   :  { %v367_v43 = vld [vmem:[#allocation5 + $0x7a8] sm:$0xff]  ;;  %1802 = vmatpush1.bf16.msra.mxu0 %v1801_v45  ;;  %v1805_v57 = vpack.c.bf16 %v366_v51, %v362_v49  ;;  %v242_v59 = vld [vmem:[#allocation5 + $0x3c0] sm:$0xff]  ;;  %v153_v41 = vld [vmem:[#allocation5 + $0xf8] sm:$0xff] }
  0xbc   :  { %v1803_v50 = vpack.c.bf16 %v367_v43, %v363_v42  ;;  %v243_v52 = vld [vmem:[#allocation5 + $0x3c8] sm:$0xff]  ;;  %1740 = vmatprep.subr.bf16.mxu1 %v1739_v46  ;;  %v246_v60 = vld [vmem:[#allocation5 + $0x3e0] sm:$0xff]  ;;  %v1951_v46 = vpack.c.bf16 %v153_v41, %v149_v40  ;;  %v152_v49 = vld [vmem:[#allocation5 + $0xf0] sm:$0xff] }
  0xbd   :  { %v247_v53 = vld [vmem:[#allocation5 + $0x3e8] sm:$0xff]  ;;  %v370_v61 = vld [vmem:[#allocation5 + $0x7c0] sm:$0xff]  ;;  %1742 = vmatpush1.bf16.msra.mxu1 %v1741_v56  ;;  %v1745_v4 = vpack.c.bf16 %v246_v60, %v242_v59  ;;  %v156_v59 = vld [vmem:[#allocation5 + $0x110] sm:$0xff] }
  0xbe   :  { %v371_v54 = vld [vmem:[#allocation5 + $0x7c8] sm:$0xff]  ;;  %v1743_v58 = vpack.c.bf16 %v247_v53, %v243_v52  ;;  %1804 = vmatprep.subr.bf16.mxu0 %v1803_v50  ;;  %v374_v63 = vld [vmem:[#allocation5 + $0x7e0] sm:$0xff]  ;;  %v157_v52 = vld [vmem:[#allocation5 + $0x118] sm:$0xff] }
  0xbf   :  { %v375_v55 = vld [vmem:[#allocation5 + $0x7e8] sm:$0xff]  ;;  %1806 = vmatpush1.bf16.msra.mxu0 %v1805_v57  ;;  %v1809_v5 = vpack.c.bf16 %v374_v63, %v370_v61  ;;  %v378_v7 = vld [vmem:[#allocation5 + $0x800] sm:$0xff]  ;;  %v161_v53 = vld [vmem:[#allocation5 + $0x138] sm:$0xff] }
  0xc0   :  { %v1807_v62 = vpack.c.bf16 %v375_v55, %v371_v54  ;;  %v379_v2 = vld [vmem:[#allocation5 + $0x808] sm:$0xff]  ;;  %1744 = vmatprep.subr.bf16.mxu1 %v1743_v58  ;;  %v382_v11 = vld [vmem:[#allocation5 + $0x820] sm:$0xff]  ;;  %v1955_v57 = vpack.c.bf16 %v161_v53, %v157_v52  ;;  %v160_v60 = vld [vmem:[#allocation5 + $0x130] sm:$0xff] }
  0xc1   :  { %v383_v3 = vld [vmem:[#allocation5 + $0x828] sm:$0xff]  ;;  %1746 = vmatpush1.bf16.msra.mxu1 %v1745_v4  ;;  %v2724_v17 = vld [vmem:[#allocation2] sm:$0xff]  ;;  %v1813_v21 = vpack.c.bf16 %v382_v11, %v378_v7  ;;  %v165_v63 = vld [vmem:[#allocation5 + $0x158] sm:$0xff] }
  0xc2   :  { %1808 = vmatprep.subr.bf16.mxu0 %v1807_v62  ;;  %v1811_v10 = vpack.c.bf16 %v383_v3, %v379_v2  ;;  %v387_v14 = vld [vmem:[#allocation5 + $0x848] sm:$0xff]  ;;  %1940 = vmatprep.subr.bf16.mxu1 %v1939_v6  ;;  %v386_v23 = vld [vmem:[#allocation5 + $0x840] sm:$0xff]  ;;  %v169_v0 = vld [vmem:[#allocation5 + $0x178] sm:$0xff]  ;;  %v1957_v3 = vpack.c.bf16 %v160_v60, %v156_v59 }
  0xc3   :  { %v391_v15 = vld [vmem:[#allocation5 + $0x868] sm:$0xff]  ;;  %1810 = vmatpush1.bf16.msra.mxu0 %v1809_v5  ;;  %v390_v27 = vld [vmem:[#allocation5 + $0x860] sm:$0xff]  ;;  %v1959_v5 = vpack.c.bf16 %v169_v0, %v165_v63  ;;  %v164_v7 = vld [vmem:[#allocation5 + $0x150] sm:$0xff] }
  0xc4   :  { %1812 = vmatprep.subr.bf16.mxu0 %v1811_v10  ;;  %v1815_v26 = vpack.c.bf16 %v391_v15, %v387_v14  ;;  %721 = vmatmul.mubr.f32.vlgmr.msra.gmra.mrb[0].mxu1 %v2724_v17  ;;  %v395_v30 = vld [vmem:[#allocation5 + $0x888] sm:$0xff]  ;;  %v1817_v33 = vpack.c.bf16 %v390_v27, %v386_v23  ;;  %v394_v35 = vld [vmem:[#allocation5 + $0x880] sm:$0xff]  ;;  %v168_v8 = vld [vmem:[#allocation5 + $0x170] sm:$0xff] }
  0xc5   :  { %v399_v31 = vld [vmem:[#allocation5 + $0x8a8] sm:$0xff]  ;;  %1942 = vmatpush1.bf16.msra.mxu1 %v1941_v20  ;;  %v398_v39 = vld [vmem:[#allocation5 + $0x8a0] sm:$0xff]  ;;  %1004 = vmatprep.mubr.f32.mxu1 %v2718_v16  ;;  %v1953_v16 = vpack.c.bf16 %v152_v49, %v148_v48  ;;  %v173_v11 = vld [vmem:[#allocation5 + $0x198] sm:$0xff]  ;;  %v1961_v15 = vpack.c.bf16 %v168_v8, %v164_v7 }
  0xc6   :  { %792 = vmatmul.mubr.f32.vlgmr.msra.gmra.mrb[0].mxu0 %v116_v18  ;;  %1944 = vmatprep.subr.bf16.mxu1 %v1943_v22  ;;  %v1819_v38 = vpack.c.bf16 %v399_v31, %v395_v30  ;;  %v403_v42 = vld [vmem:[#allocation5 + $0x8c8] sm:$0xff]  ;;  %v1821_v45 = vpack.c.bf16 %v398_v39, %v394_v35  ;;  %v402_v47 = vld [vmem:[#allocation5 + $0x8c0] sm:$0xff]  ;;  %v177_v12 = vld [vmem:[#allocation5 + $0x1b8] sm:$0xff] }
  0xc7   :  { %1814 = vmatpush1.bf16.msra.mxu0 %v1813_v21  ;;  %v407_v43 = vld [vmem:[#allocation5 + $0x8e8] sm:$0xff]  ;;  %v406_v51 = vld [vmem:[#allocation5 + $0x8e0] sm:$0xff]  ;;  %v1963_v21 = vpack.c.bf16 %v177_v12, %v173_v11  ;;  %v172_v23 = vld [vmem:[#allocation5 + $0x190] sm:$0xff] }
  0xc8   :  { %1816 = vmatprep.subr.bf16.mxu0 %v1815_v26  ;;  %v1823_v50 = vpack.c.bf16 %v407_v43, %v403_v42  ;;  %v411_v54 = vld [vmem:[#allocation5 + $0x908] sm:$0xff]  ;;  %v1825_v56 = vpack.c.bf16 %v406_v51, %v402_v47  ;;  %v410_v58 = vld [vmem:[#allocation5 + $0x900] sm:$0xff]  ;;  %v176_v24 = vld [vmem:[#allocation5 + $0x1b0] sm:$0xff] }
  0xc9   :  { %1946 = vmatpush1.bf16.msra.mxu1 %v1945_v32  ;;  %v415_v55 = vld [vmem:[#allocation5 + $0x928] sm:$0xff]  ;;  %v414_v62 = vld [vmem:[#allocation5 + $0x920] sm:$0xff]  ;;  %v181_v26 = vld [vmem:[#allocation5 + $0x1d8] sm:$0xff]  ;;  %v1965_v31 = vpack.c.bf16 %v176_v24, %v172_v23 }
  0xca   :  { %1948 = vmatprep.subr.bf16.mxu1 %v1947_v34  ;;  %v1827_v61 = vpack.c.bf16 %v415_v55, %v411_v54  ;;  %v419_v1 = vld [vmem:[#allocation5 + $0x948] sm:$0xff]  ;;  %v1829_v4 = vpack.c.bf16 %v414_v62, %v410_v58  ;;  %v418_v6 = vld [vmem:[#allocation5 + $0x940] sm:$0xff]  ;;  %v185_v27 = vld [vmem:[#allocation5 + $0x1f8] sm:$0xff] }
  0xcb   :  { %1818 = vmatpush1.bf16.msra.mxu0 %v1817_v33  ;;  %v423_v2 = vld [vmem:[#allocation5 + $0x968] sm:$0xff]  ;;  %v422_v10 = vld [vmem:[#allocation5 + $0x960] sm:$0xff]  ;;  %v1967_v33 = vpack.c.bf16 %v185_v27, %v181_v26  ;;  %v180_v35 = vld [vmem:[#allocation5 + $0x1d0] sm:$0xff] }
  0xcc   :  { %1820 = vmatprep.subr.bf16.mxu0 %v1819_v38  ;;  %v1831_v9 = vpack.c.bf16 %v423_v2, %v419_v1  ;;  %v427_v13 = vld [vmem:[#allocation5 + $0x988] sm:$0xff]  ;;  %v426_v18 = vld [vmem:[#allocation5 + $0x980] sm:$0xff]  ;;  %v1833_v20 = vpack.c.bf16 %v422_v10, %v418_v6  ;;  %v184_v36 = vld [vmem:[#allocation5 + $0x1f0] sm:$0xff] }
  0xcd   :  { %1950 = vmatpush1.bf16.msra.mxu1 %v1949_v44  ;;  %v431_v14 = vld [vmem:[#allocation5 + $0x9a8] sm:$0xff]  ;;  %v430_v22 = vld [vmem:[#allocation5 + $0x9a0] sm:$0xff]  ;;  %v189_v39 = vld [vmem:[#allocation5 + $0x218] sm:$0xff]  ;;  %v1969_v43 = vpack.c.bf16 %v184_v36, %v180_v35 }
  0xce   :  { %1952 = vmatprep.subr.bf16.mxu1 %v1951_v46  ;;  %v1835_v25 = vpack.c.bf16 %v431_v14, %v427_v13  ;;  %v2728_v28 = vld [vmem:[#allocation2 + $0x28] sm:$0xff]  ;;  %v1837_v32 = vpack.c.bf16 %v430_v22, %v426_v18  ;;  %v434_v34 = vld [vmem:[#allocation5 + $0x9c0] sm:$0xff]  ;;  %v193_v40 = vld [vmem:[#allocation5 + $0x238] sm:$0xff] }
  0xcf   :  { %1822 = vmatpush1.bf16.msra.mxu0 %v1821_v45  ;;  %v435_v29 = vld [vmem:[#allocation5 + $0x9c8] sm:$0xff]  ;;  %862 = vmatprep.mubr.f32.mxu0 %v2728_v28  ;;  %v438_v38 = vld [vmem:[#allocation5 + $0x9e0] sm:$0xff]  ;;  %v1971_v45 = vpack.c.bf16 %v193_v40, %v189_v39  ;;  %v188_v47 = vld [vmem:[#allocation5 + $0x210] sm:$0xff] }
  0xd0   :  { %1824 = vmatprep.subr.bf16.mxu0 %v1823_v50  ;;  %v439_v30 = vld [vmem:[#allocation5 + $0x9e8] sm:$0xff]  ;;  %v1841_v44 = vpack.c.bf16 %v438_v38, %v434_v34  ;;  %v442_v46 = vld [vmem:[#allocation5 + $0xa00] sm:$0xff]  ;;  %v192_v48 = vld [vmem:[#allocation5 + $0x230] sm:$0xff] }
  0xd1   :  { %1954 = vmatpush1.bf16.msra.mxu1 %v1953_v16  ;;  %v1839_v37 = vpack.c.bf16 %v439_v30, %v435_v29  ;;  %v443_v41 = vld [vmem:[#allocation5 + $0xa08] sm:$0xff]  ;;  %v446_v50 = vld [vmem:[#allocation5 + $0xa20] sm:$0xff]  ;;  %v197_v51 = vld [vmem:[#allocation5 + $0x258] sm:$0xff]  ;;  %v1973_v55 = vpack.c.bf16 %v192_v48, %v188_v47 }
  0xd2   :  { %1956 = vmatprep.subr.bf16.mxu1 %v1955_v57  ;;  %v447_v42 = vld [vmem:[#allocation5 + $0xa28] sm:$0xff]  ;;  %v201_v52 = vld [vmem:[#allocation5 + $0x278] sm:$0xff]  ;;  %v1845_v16 = vpack.c.bf16 %v446_v50, %v442_v46  ;;  %v450_v57 = vld [vmem:[#allocation5 + $0xa40] sm:$0xff] }
  0xd3   :  { %1826 = vmatpush1.bf16.msra.mxu0 %v1825_v56  ;;  %v1843_v49 = vpack.c.bf16 %v447_v42, %v443_v41  ;;  %v451_v53 = vld [vmem:[#allocation5 + $0xa48] sm:$0xff]  ;;  %v1975_v56 = vpack.c.bf16 %v201_v52, %v197_v51  ;;  %v196_v58 = vld [vmem:[#allocation5 + $0x250] sm:$0xff]  ;;  %v205_v62 = vld [vmem:[#allocation5 + $0x298] sm:$0xff] }
  0xd4   :  { %1828 = vmatprep.subr.bf16.mxu0 %v1827_v61  ;;  %v455_v54 = vld [vmem:[#allocation5 + $0xa68] sm:$0xff]  ;;  %v200_v59 = vld [vmem:[#allocation5 + $0x270] sm:$0xff]  ;;  %v454_v61 = vld [vmem:[#allocation5 + $0xa60] sm:$0xff] }
  0xd5   :  { %1958 = vmatpush1.bf16.msra.mxu1 %v1957_v3  ;;  %v1847_v60 = vpack.c.bf16 %v455_v54, %v451_v53  ;;  %v209_v63 = vld [vmem:[#allocation5 + $0x2b8] sm:$0xff]  ;;  %v459_v0 = vld [vmem:[#allocation5 + $0xa88] sm:$0xff]  ;;  %v1977_v2 = vpack.c.bf16 %v200_v59, %v196_v58  ;;  %v1849_v3 = vpack.c.bf16 %v454_v61, %v450_v57  ;;  %v204_v6 = vld [vmem:[#allocation5 + $0x290] sm:$0xff] }
  0xd6   :  { %1960 = vmatprep.subr.bf16.mxu1 %v1959_v5  ;;  %v463_v1 = vld [vmem:[#allocation5 + $0xaa8] sm:$0xff]  ;;  %v458_v5 = vld [vmem:[#allocation5 + $0xa80] sm:$0xff]  ;;  %v208_v7 = vld [vmem:[#allocation5 + $0x2b0] sm:$0xff] }
  0xd7   :  { %1830 = vmatpush1.bf16.msra.mxu0 %v1829_v4  ;;  %v1979_v4 = vpack.c.bf16 %v209_v63, %v205_v62  ;;  %v1851_v8 = vpack.c.bf16 %v463_v1, %v459_v0  ;;  %v213_v10 = vld [vmem:[#allocation5 + $0x2d8] sm:$0xff]  ;;  %v467_v12 = vld [vmem:[#allocation5 + $0xac8] sm:$0xff]  ;;  %v1981_v14 = vpack.c.bf16 %v208_v7, %v204_v6  ;;  %v216_v22 = vld [vmem:[#allocation5 + $0x2f0] sm:$0xff] }
  0xd8   :  { %1832 = vmatprep.subr.bf16.mxu0 %v1831_v9  ;;  %v462_v9 = vld [vmem:[#allocation5 + $0xaa0] sm:$0xff]  ;;  %v217_v11 = vld [vmem:[#allocation5 + $0x2f8] sm:$0xff]  ;;  %v471_v13 = vld [vmem:[#allocation5 + $0xae8] sm:$0xff] }
  0xd9   :  { %1962 = vmatpush1.bf16.msra.mxu1 %v1961_v15  ;;  %v1853_v15 = vpack.c.bf16 %v462_v9, %v458_v5  ;;  %v1983_v18 = vpack.c.bf16 %v217_v11, %v213_v10  ;;  %v1855_v23 = vpack.c.bf16 %v471_v13, %v467_v12  ;;  %v470_v24 = vld [vmem:[#allocation5 + $0xae0] sm:$0xff]  ;;  %v225_v26 = vld [vmem:[#allocation5 + $0x338] sm:$0xff]  ;;  %v475_v27 = vld [vmem:[#allocation5 + $0xb08] sm:$0xff] }
  0xda   :  { %1964 = vmatprep.subr.bf16.mxu1 %v1963_v21  ;;  %v212_v21 = vld [vmem:[#allocation5 + $0x2d0] sm:$0xff]  ;;  %v479_v29 = vld [vmem:[#allocation5 + $0xb28] sm:$0xff]  ;;  %v229_v38 = vld [vmem:[#allocation5 + $0x358] sm:$0xff] }
  0xdb   :  { %1834 = vmatpush1.bf16.msra.mxu0 %v1833_v20  ;;  %v466_v20 = vld [vmem:[#allocation5 + $0xac0] sm:$0xff]  ;;  %v1985_v30 = vpack.c.bf16 %v216_v22, %v212_v21  ;;  %v220_v34 = vld [vmem:[#allocation5 + $0x310] sm:$0xff]  ;;  %v1859_v36 = vpack.c.bf16 %v479_v29, %v475_v27  ;;  %v233_v39 = vld [vmem:[#allocation5 + $0x378] sm:$0xff] }
  0xdc   :  { %1836 = vmatprep.subr.bf16.mxu0 %v1835_v25  ;;  %v221_v25 = vld [vmem:[#allocation5 + $0x318] sm:$0xff]  ;;  %v224_v35 = vld [vmem:[#allocation5 + $0x330] sm:$0xff]  ;;  %v483_v40 = vld [vmem:[#allocation5 + $0xb48] sm:$0xff] }
  0xdd   :  { %1966 = vmatpush1.bf16.msra.mxu1 %v1965_v31  ;;  %v1857_v31 = vpack.c.bf16 %v470_v24, %v466_v20  ;;  %v487_v41 = vld [vmem:[#allocation5 + $0xb68] sm:$0xff]  ;;  %v1989_v42 = vpack.c.bf16 %v224_v35, %v220_v34  ;;  %v228_v46 = vld [vmem:[#allocation5 + $0x350] sm:$0xff]  ;;  %v237_v50 = vld [vmem:[#allocation5 + $0x398] sm:$0xff] }
  0xde   :  { %1968 = vmatprep.subr.bf16.mxu1 %v1967_v33  ;;  %v474_v33 = vld [vmem:[#allocation5 + $0xb00] sm:$0xff]  ;;  %v232_v47 = vld [vmem:[#allocation5 + $0x370] sm:$0xff]  ;;  %v1863_v48 = vpack.c.bf16 %v487_v41, %v483_v40  ;;  %v241_v51 = vld [vmem:[#allocation5 + $0x3b8] sm:$0xff] }
  0xdf   :  { %1838 = vmatpush1.bf16.msra.mxu0 %v1837_v32  ;;  %v1987_v32 = vpack.c.bf16 %v225_v26, %v221_v25  ;;  %v491_v52 = vld [vmem:[#allocation5 + $0xb88] sm:$0xff]  ;;  %v1993_v54 = vpack.c.bf16 %v232_v47, %v228_v46  ;;  %v236_v57 = vld [vmem:[#allocation5 + $0x390] sm:$0xff]  ;;  %v245_v61 = vld [vmem:[#allocation5 + $0x3d8] sm:$0xff] }
  0xe0   :  { %1840 = vmatprep.subr.bf16.mxu0 %v1839_v37  ;;  %v478_v37 = vld [vmem:[#allocation5 + $0xb20] sm:$0xff]  ;;  %v495_v53 = vld [vmem:[#allocation5 + $0xba8] sm:$0xff]  ;;  %v240_v58 = vld [vmem:[#allocation5 + $0x3b0] sm:$0xff] }
  0xe1   :  { %1970 = vmatpush1.bf16.msra.mxu1 %v1969_v43  ;;  %v1861_v43 = vpack.c.bf16 %v478_v37, %v474_v33  ;;  %v1867_v59 = vpack.c.bf16 %v495_v53, %v491_v52  ;;  %v249_v62 = vld [vmem:[#allocation5 + $0x3f8] sm:$0xff]  ;;  %v499_v63 = vld [vmem:[#allocation5 + $0xbc8] sm:$0xff]  ;;  %v1997_v1 = vpack.c.bf16 %v240_v58, %v236_v57  ;;  %v244_v5 = vld [vmem:[#allocation5 + $0x3d0] sm:$0xff] }
  0xe2   :  { %1972 = vmatprep.subr.bf16.mxu1 %v1971_v45  ;;  %v482_v45 = vld [vmem:[#allocation5 + $0xb40] sm:$0xff]  ;;  %v503_v0 = vld [vmem:[#allocation5 + $0xbe8] sm:$0xff]  ;;  %v248_v6 = vld [vmem:[#allocation5 + $0x3f0] sm:$0xff] }
  0xe3   :  { %1842 = vmatpush1.bf16.msra.mxu0 %v1841_v44  ;;  %v1991_v44 = vpack.c.bf16 %v233_v39, %v229_v38  ;;  %v1871_v7 = vpack.c.bf16 %v503_v0, %v499_v63  ;;  %v253_v9 = vld [vmem:[#allocation5 + $0x418] sm:$0xff]  ;;  %v507_v11 = vld [vmem:[#allocation5 + $0xc08] sm:$0xff]  ;;  %v2001_v13 = vpack.c.bf16 %v248_v6, %v244_v5  ;;  %v252_v20 = vld [vmem:[#allocation5 + $0x410] sm:$0xff] }
  0xe4   :  { %1844 = vmatprep.subr.bf16.mxu0 %v1843_v49  ;;  %v486_v49 = vld [vmem:[#allocation5 + $0xb60] sm:$0xff]  ;;  %v257_v10 = vld [vmem:[#allocation5 + $0x438] sm:$0xff]  ;;  %v511_v12 = vld [vmem:[#allocation5 + $0xc28] sm:$0xff] }
  0xe5   :  { %1974 = vmatpush1.bf16.msra.mxu1 %v1973_v55  ;;  %v1865_v55 = vpack.c.bf16 %v486_v49, %v482_v45  ;;  %v256_v21 = vld [vmem:[#allocation5 + $0x430] sm:$0xff]  ;;  %v1875_v22 = vpack.c.bf16 %v511_v12, %v507_v11  ;;  %v261_v24 = vld [vmem:[#allocation5 + $0x458] sm:$0xff]  ;;  %v515_v26 = vld [vmem:[#allocation5 + $0xc48] sm:$0xff] }
  0xe6   :  { %1976 = vmatprep.subr.bf16.mxu1 %v1975_v56  ;;  %v490_v56 = vld [vmem:[#allocation5 + $0xb80] sm:$0xff]  ;;  %v265_v25 = vld [vmem:[#allocation5 + $0x478] sm:$0xff]  ;;  %v519_v27 = vld [vmem:[#allocation5 + $0xc68] sm:$0xff] }
  0xe7   :  { %1846 = vmatpush1.bf16.msra.mxu0 %v1845_v16  ;;  %v1995_v16 = vpack.c.bf16 %v241_v51, %v237_v50  ;;  %v2731_v29 = vld [vmem:[#allocation2 + $0x20] sm:$0xff]  ;;  %v260_v34 = vld [vmem:[#allocation5 + $0x450] sm:$0xff]  ;;  %v269_v38 = vld [vmem:[#allocation5 + $0x498] sm:$0xff] }
  0xe8   :  { %1848 = vmatprep.subr.bf16.mxu0 %v1847_v60  ;;  %v494_v60 = vld [vmem:[#allocation5 + $0xba0] sm:$0xff]  ;;  %v264_v35 = vld [vmem:[#allocation5 + $0x470] sm:$0xff]  ;;  %v273_v39 = vld [vmem:[#allocation5 + $0x4b8] sm:$0xff] }
  0xe9   :  { %1978 = vmatpush1.bf16.msra.mxu1 %v1977_v2  ;;  %v1869_v2 = vpack.c.bf16 %v494_v60, %v490_v56  ;;  %v514_v33 = vld [vmem:[#allocation5 + $0xc40] sm:$0xff]  ;;  %v523_v40 = vld [vmem:[#allocation5 + $0xc88] sm:$0xff]  ;;  %v2011_v45 = vpack.c.bf16 %v273_v39, %v269_v38  ;;  %v268_v47 = vld [vmem:[#allocation5 + $0x490] sm:$0xff] }
  0xea   :  { %1980 = vmatprep.subr.bf16.mxu1 %v1979_v4  ;;  %v498_v4 = vld [vmem:[#allocation5 + $0xbc0] sm:$0xff]  ;;  %v527_v41 = vld [vmem:[#allocation5 + $0xca8] sm:$0xff]  ;;  %v277_v51 = vld [vmem:[#allocation5 + $0x4d8] sm:$0xff] }
  0xeb   :  { %1850 = vmatpush1.bf16.msra.mxu0 %v1849_v3  ;;  %v1999_v3 = vpack.c.bf16 %v249_v62, %v245_v61  ;;  %v518_v37 = vld [vmem:[#allocation5 + $0xc60] sm:$0xff]  ;;  %v1883_v49 = vpack.c.bf16 %v527_v41, %v523_v40  ;;  %v531_v52 = vld [vmem:[#allocation5 + $0xcc8] sm:$0xff]  ;;  %v276_v57 = vld [vmem:[#allocation5 + $0x4d0] sm:$0xff] }
  0xec   :  { %1852 = vmatprep.subr.bf16.mxu0 %v1851_v8  ;;  %v502_v8 = vld [vmem:[#allocation5 + $0xbe0] sm:$0xff]  ;;  %v535_v53 = vld [vmem:[#allocation5 + $0xce8] sm:$0xff]  ;;  %v280_v58 = vld [vmem:[#allocation5 + $0x4f0] sm:$0xff] }
  0xed   :  { %1982 = vmatpush1.bf16.msra.mxu1 %v1981_v14  ;;  %v1873_v14 = vpack.c.bf16 %v502_v8, %v498_v4  ;;  %v522_v46 = vld [vmem:[#allocation5 + $0xc80] sm:$0xff]  ;;  %v285_v61 = vld [vmem:[#allocation5 + $0x518] sm:$0xff]  ;;  %v539_v63 = vld [vmem:[#allocation5 + $0xd08] sm:$0xff] }
  0xee   :  { %1984 = vmatprep.subr.bf16.mxu1 %v1983_v18  ;;  %v506_v18 = vld [vmem:[#allocation5 + $0xc00] sm:$0xff]  ;;  %v289_v62 = vld [vmem:[#allocation5 + $0x538] sm:$0xff]  ;;  %v543_v0 = vld [vmem:[#allocation5 + $0xd28] sm:$0xff] }
  0xef   :  { %1854 = vmatpush1.bf16.msra.mxu0 %v1853_v15  ;;  %v2003_v15 = vpack.c.bf16 %v257_v10, %v253_v9  ;;  %v526_v50 = vld [vmem:[#allocation5 + $0xca0] sm:$0xff]  ;;  %v284_v4 = vld [vmem:[#allocation5 + $0x510] sm:$0xff]  ;;  %v1891_v6 = vpack.c.bf16 %v543_v0, %v539_v63  ;;  %v293_v8 = vld [vmem:[#allocation5 + $0x558] sm:$0xff] }
  0xf0   :  { %1856 = vmatprep.subr.bf16.mxu0 %v1855_v23  ;;  %v510_v23 = vld [vmem:[#allocation5 + $0xc20] sm:$0xff]  ;;  %v288_v5 = vld [vmem:[#allocation5 + $0x530] sm:$0xff]  ;;  %v297_v9 = vld [vmem:[#allocation5 + $0x578] sm:$0xff] }
  0xf1   :  { %1986 = vmatpush1.bf16.msra.mxu1 %v1985_v30  ;;  %v2005_v30 = vpack.c.bf16 %v256_v21, %v252_v20  ;;  %v530_v56 = vld [vmem:[#allocation5 + $0xcc0] sm:$0xff]  ;;  %v547_v10 = vld [vmem:[#allocation5 + $0xd48] sm:$0xff]  ;;  %v2021_v12 = vpack.c.bf16 %v288_v5, %v284_v4  ;;  %v296_v20 = vld [vmem:[#allocation5 + $0x570] sm:$0xff] }
  0xf2   :  { %1988 = vmatprep.subr.bf16.mxu1 %v1987_v32  ;;  %v2007_v32 = vpack.c.bf16 %v265_v25, %v261_v24  ;;  %v534_v60 = vld [vmem:[#allocation5 + $0xce0] sm:$0xff]  ;;  %v551_v11 = vld [vmem:[#allocation5 + $0xd68] sm:$0xff]  ;;  %v305_v24 = vld [vmem:[#allocation5 + $0x5b8] sm:$0xff] }
  0xf3   :  { %1858 = vmatpush1.bf16.msra.mxu0 %v1857_v31  ;;  %v1877_v31 = vpack.c.bf16 %v510_v23, %v506_v18  ;;  %v292_v18 = vld [vmem:[#allocation5 + $0x550] sm:$0xff]  ;;  %v1895_v21 = vpack.c.bf16 %v551_v11, %v547_v10  ;;  %v301_v23 = vld [vmem:[#allocation5 + $0x598] sm:$0xff]  ;;  %v555_v25 = vld [vmem:[#allocation5 + $0xd88] sm:$0xff] }
  0xf4   :  { %1860 = vmatprep.subr.bf16.mxu0 %v1859_v36  ;;  %v1879_v36 = vpack.c.bf16 %v519_v27, %v515_v26  ;;  %v559_v26 = vld [vmem:[#allocation5 + $0xda8] sm:$0xff]  ;;  %v2025_v27 = vpack.c.bf16 %v296_v20, %v292_v18  ;;  %v313_v38 = vld [vmem:[#allocation5 + $0x5f8] sm:$0xff]  ;;  %v328_v4 = vld [vmem:[#allocation5 + $0x670] sm:$0xff] }
  0xf5   :  { %1990 = vmatpush1.bf16.msra.mxu1 %v1989_v42  ;;  %v2734_v42 = vld [vmem:[#allocation2 + $0x38] sm:$0xff]  ;;  %v563_v39 = vld [vmem:[#allocation5 + $0xdc8] sm:$0xff]  ;;  %v336_v18 = vld [vmem:[#allocation5 + $0x6b0] sm:$0xff] }
  0xf6   :  { %1992 = vmatprep.subr.bf16.mxu1 %v1991_v44  ;;  %v1881_v44 = vpack.c.bf16 %v518_v37, %v514_v33  ;;  %v300_v33 = vld [vmem:[#allocation5 + $0x590] sm:$0xff]  ;;  %v309_v37 = vld [vmem:[#allocation5 + $0x5d8] sm:$0xff]  ;;  %v567_v40 = vld [vmem:[#allocation5 + $0xde8] sm:$0xff] }
  0xf7   :  { %1862 = vmatpush1.bf16.msra.mxu0 %v1861_v43  ;;  %v2009_v43 = vpack.c.bf16 %v264_v35, %v260_v34  ;;  %v304_v34 = vld [vmem:[#allocation5 + $0x5b0] sm:$0xff]  ;;  %v1899_v35 = vpack.c.bf16 %v559_v26, %v555_v25  ;;  %v583_v63 = vld [vmem:[#allocation5 + $0xe68] sm:$0xff] }
  0xf8   :  { %1864 = vmatprep.subr.bf16.mxu0 %v1863_v48  ;;  %v272_v48 = vld [vmem:[#allocation5 + $0x4b0] sm:$0xff]  ;;  %v2029_v41 = vpack.c.bf16 %v304_v34, %v300_v33  ;;  %v591_v10 = vld [vmem:[#allocation5 + $0xea8] sm:$0xff] }
  0xf9   :  { %1994 = vmatpush1.bf16.msra.mxu1 %v1993_v54  ;;  %v2013_v54 = vpack.c.bf16 %v272_v48, %v268_v47  ;;  %v312_v47 = vld [vmem:[#allocation5 + $0x5f0] sm:$0xff]  ;;  %v1903_v48 = vpack.c.bf16 %v567_v40, %v563_v39  ;;  %v599_v25 = vld [vmem:[#allocation5 + $0xee8] sm:$0xff] }
  0xfa   :  { %1996 = vmatprep.subr.bf16.mxu1 %v1995_v16  ;;  %v344_v33 = vld [vmem:[#allocation5 + $0x6f0] sm:$0xff]  ;;  %v607_v39 = vld [vmem:[#allocation5 + $0xf28] sm:$0xff] }
  0xfb   :  { %1866 = vmatpush1.bf16.msra.mxu0 %v1865_v55  ;;  %v1885_v55 = vpack.c.bf16 %v526_v50, %v522_v46  ;;  %v308_v46 = vld [vmem:[#allocation5 + $0x5d0] sm:$0xff]  ;;  %v317_v50 = vld [vmem:[#allocation5 + $0x618] sm:$0xff] }
  0xfc   :  { %1868 = vmatprep.subr.bf16.mxu0 %v1867_v59  ;;  %v1887_v59 = vpack.c.bf16 %v535_v53, %v531_v52  ;;  %v575_v52 = vld [vmem:[#allocation5 + $0xe28] sm:$0xff]  ;;  %v2033_v53 = vpack.c.bf16 %v312_v47, %v308_v46  ;;  %v352_v46 = vld [vmem:[#allocation5 + $0x730] sm:$0xff] }
  0xfd   :  { %1998 = vmatpush1.bf16.msra.mxu1 %v1997_v1  ;;  %v2017_v1 = vpack.c.bf16 %v280_v58, %v276_v57  ;;  %v320_v57 = vld [vmem:[#allocation5 + $0x630] sm:$0xff] }
  0xfe   :  { %2000 = vmatprep.subr.bf16.mxu1 %v1999_v3  ;;  %v538_v3 = vld [vmem:[#allocation5 + $0xd00] sm:$0xff] }
  0xff   :  { %1870 = vmatpush1.bf16.msra.mxu0 %v1869_v2  ;;  %v2019_v2 = vpack.c.bf16 %v289_v62, %v285_v61  ;;  %v329_v61 = vld [vmem:[#allocation5 + $0x678] sm:$0xff]  ;;  %v579_v62 = vld [vmem:[#allocation5 + $0xe48] sm:$0xff] }
 0x100   :  { %1872 = vmatprep.subr.bf16.mxu0 %v1871_v7  ;;  %v542_v7 = vld [vmem:[#allocation5 + $0xd20] sm:$0xff]  ;;  %v1911_v5 = vpack.c.bf16 %v583_v63, %v579_v62  ;;  %v623_v62 = vld [vmem:[#allocation5 + $0xfa8] sm:$0xff] }
 0x101   :  { %2002 = vmatpush1.bf16.msra.mxu1 %v2001_v13  ;;  %v1893_v13 = vpack.c.bf16 %v542_v7, %v538_v3  ;;  %v324_v3 = vld [vmem:[#allocation5 + $0x650] sm:$0xff]  ;;  %v333_v7 = vld [vmem:[#allocation5 + $0x698] sm:$0xff] }
 0x102   :  { %2004 = vmatprep.subr.bf16.mxu1 %v2003_v15  ;;  %v546_v15 = vld [vmem:[#allocation5 + $0xd40] sm:$0xff]  ;;  %v2041_v11 = vpack.c.bf16 %v328_v4, %v324_v3  ;;  %v368_v3 = vld [vmem:[#allocation5 + $0x7b0] sm:$0xff] }
 0x103   :  { %1874 = vmatpush1.bf16.msra.mxu0 %v1873_v14  ;;  %v2023_v14 = vpack.c.bf16 %v297_v9, %v293_v8  ;;  %v337_v8 = vld [vmem:[#allocation5 + $0x6b8] sm:$0xff]  ;;  %v587_v9 = vld [vmem:[#allocation5 + $0xe88] sm:$0xff] }
 0x104   :  { %1876 = vmatprep.subr.bf16.mxu0 %v1875_v22  ;;  %1005 = vmatmul.mubr.f32.vlgmr.msra.gmra.mrb[2].mxu1 %v2724_v17  ;;  %v281_v17 = vld [vmem:[#allocation5 + $0x4f8] sm:$0xff]  ;;  %v550_v22 = vld [vmem:[#allocation5 + $0xd60] sm:$0xff]  ;;  %v1915_v20 = vpack.c.bf16 %v591_v10, %v587_v9  ;;  %v631_v9 = vld [vmem:[#allocation5 + $0xfe8] sm:$0xff] }
 0x105   :  { %2006 = vmatpush1.bf16.msra.mxu1 %v2005_v30  ;;  %1075 = vmatprep.mubr.f32.mxu1 %v2721_v19  ;;  %v2015_v16 = vpack.c.bf16 %v281_v17, %v277_v51  ;;  %v1889_v19 = vpack.c.bf16 %v534_v60, %v530_v56  ;;  %v1897_v30 = vpack.c.bf16 %v550_v22, %v546_v15  ;;  %v321_v51 = vld [vmem:[#allocation5 + $0x638] sm:$0xff]  ;;  %v571_v17 = vld [vmem:[#allocation5 + $0xe08] sm:$0xff]  ;;  %v316_v56 = vld [vmem:[#allocation5 + $0x610] sm:$0xff] }
 0x106   :  { %863 = vmatmul.mubr.f32.vlgmr.msra.gmra.mrb[0].mxu0 %v2731_v29  ;;  %2008 = vmatprep.subr.bf16.mxu1 %v2007_v32  ;;  %v554_v32 = vld [vmem:[#allocation5 + $0xd80] sm:$0xff]  ;;  %v1907_v58 = vpack.c.bf16 %v575_v52, %v571_v17  ;;  %v325_v60 = vld [vmem:[#allocation5 + $0x658] sm:$0xff]  ;;  %v2037_v0 = vpack.c.bf16 %v320_v57, %v316_v56  ;;  %v332_v15 = vld [vmem:[#allocation5 + $0x690] sm:$0xff] }
 0x107   :  { %1878 = vmatpush1.bf16.msra.mxu0 %v1877_v31  ;;  %933 = vmatprep.mubr.f32.mxu0 %v2734_v42  ;;  %v2027_v31 = vpack.c.bf16 %v305_v24, %v301_v23  ;;  %v341_v22 = vld [vmem:[#allocation5 + $0x6d8] sm:$0xff]  ;;  %v595_v24 = vld [vmem:[#allocation5 + $0xec8] sm:$0xff]  ;;  %v2045_v26 = vpack.c.bf16 %v336_v18, %v332_v15  ;;  %v360_v56 = vld [vmem:[#allocation5 + $0x770] sm:$0xff] }
 0x108   :  { %1880 = vmatprep.subr.bf16.mxu0 %v1879_v36  ;;  %v558_v36 = vld [vmem:[#allocation5 + $0xda0] sm:$0xff]  ;;  %v345_v23 = vld [vmem:[#allocation5 + $0x6f8] sm:$0xff]  ;;  %v1919_v34 = vpack.c.bf16 %v599_v25, %v595_v24  ;;  %v615_v17 = vld [vmem:[#allocation5 + $0xf68] sm:$0xff] }
 0x109   :  { %2010 = vmatpush1.bf16.msra.mxu1 %v2009_v43  ;;  %v1901_v43 = vpack.c.bf16 %v558_v36, %v554_v32  ;;  %v340_v32 = vld [vmem:[#allocation5 + $0x6d0] sm:$0xff]  ;;  %v349_v36 = vld [vmem:[#allocation5 + $0x718] sm:$0xff] }
 0x10a   :  { %2012 = vmatprep.subr.bf16.mxu1 %v2011_v45  ;;  %v562_v45 = vld [vmem:[#allocation5 + $0xdc0] sm:$0xff]  ;;  %v2049_v40 = vpack.c.bf16 %v344_v33, %v340_v32  ;;  %v376_v15 = vld [vmem:[#allocation5 + $0x7f0] sm:$0xff] }
 0x10b   :  { %1882 = vmatpush1.bf16.msra.mxu0 %v1881_v44  ;;  %v2031_v44 = vpack.c.bf16 %v313_v38, %v309_v37  ;;  %v353_v37 = vld [vmem:[#allocation5 + $0x738] sm:$0xff]  ;;  %v603_v38 = vld [vmem:[#allocation5 + $0xf08] sm:$0xff]  ;;  %v2739_v33 = vld [vmem:[#allocation2 + $0x30] sm:$0xff] }
 0x10c   :  { %1884 = vmatprep.subr.bf16.mxu0 %v1883_v49  ;;  %v566_v49 = vld [vmem:[#allocation5 + $0xde0] sm:$0xff]  ;;  %v1923_v47 = vpack.c.bf16 %v607_v39, %v603_v38  ;;  %v401_v38 = vld [vmem:[#allocation5 + $0x8b8] sm:$0xff]  ;;  %v2393_v39 = vld [vmem:[#allocation2 + $0x10] sm:$0xff] }
 0x10d   :  { %2014 = vmatpush1.bf16.msra.mxu1 %v2013_v54  ;;  %v1905_v54 = vpack.c.bf16 %v566_v49, %v562_v45  ;;  %v348_v45 = vld [vmem:[#allocation5 + $0x710] sm:$0xff]  ;;  %v357_v49 = vld [vmem:[#allocation5 + $0x758] sm:$0xff] }
 0x10e   :  { %2016 = vmatprep.subr.bf16.mxu1 %v2015_v16  ;;  %v570_v16 = vld [vmem:[#allocation5 + $0xe00] sm:$0xff]  ;;  %v2053_v52 = vpack.c.bf16 %v352_v46, %v348_v45 }
 0x10f   :  { %1886 = vmatpush1.bf16.msra.mxu0 %v1885_v55  ;;  %v2035_v55 = vpack.c.bf16 %v321_v51, %v317_v50  ;;  %v361_v50 = vld [vmem:[#allocation5 + $0x778] sm:$0xff]  ;;  %v611_v51 = vld [vmem:[#allocation5 + $0xf48] sm:$0xff] }
 0x110   :  { %1888 = vmatprep.subr.bf16.mxu0 %v1887_v59  ;;  %v574_v59 = vld [vmem:[#allocation5 + $0xe20] sm:$0xff]  ;;  %v1927_v57 = vpack.c.bf16 %v615_v17, %v611_v51 }
 0x111   :  { %2018 = vmatpush1.bf16.msra.mxu1 %v2017_v1  ;;  %v1909_v1 = vpack.c.bf16 %v574_v59, %v570_v16  ;;  %v356_v16 = vld [vmem:[#allocation5 + $0x750] sm:$0xff]  ;;  %v365_v59 = vld [vmem:[#allocation5 + $0x798] sm:$0xff]  ;;  %v1228_v45 = vld [vmem:[#allocation8] sm:$0xff] }
 0x112   :  { %2020 = vmatprep.subr.bf16.mxu1 %v2019_v2  ;;  %v578_v2 = vld [vmem:[#allocation5 + $0xe40] sm:$0xff]  ;;  %v2057_v63 = vpack.c.bf16 %v360_v56, %v356_v16  ;;  %v405_v16 = vld [vmem:[#allocation5 + $0x8d8] sm:$0xff] }
 0x113   :  { %1890 = vmatpush1.bf16.msra.mxu0 %v1889_v19  ;;  %v2039_v19 = vpack.c.bf16 %v329_v61, %v325_v60  ;;  %v369_v60 = vld [vmem:[#allocation5 + $0x7b8] sm:$0xff]  ;;  %v619_v61 = vld [vmem:[#allocation5 + $0xf88] sm:$0xff] }
 0x114   :  { %1892 = vmatprep.subr.bf16.mxu0 %v1891_v6  ;;  %v582_v6 = vld [vmem:[#allocation5 + $0xe60] sm:$0xff]  ;;  %v1931_v4 = vpack.c.bf16 %v623_v62, %v619_v61  ;;  %v409_v56 = vld [vmem:[#allocation5 + $0x8f8] sm:$0xff] }
 0x115   :  { %2022 = vmatpush1.bf16.msra.mxu1 %v2021_v12  ;;  %v1913_v12 = vpack.c.bf16 %v582_v6, %v578_v2  ;;  %v364_v2 = vld [vmem:[#allocation5 + $0x790] sm:$0xff]  ;;  %v373_v6 = vld [vmem:[#allocation5 + $0x7d8] sm:$0xff]  ;;  %v1236_v62 = vld [vmem:[#allocation8 + $0x40] sm:$0xff] }
 0x116   :  { %2024 = vmatprep.subr.bf16.mxu1 %v2023_v14  ;;  %v586_v14 = vld [vmem:[#allocation5 + $0xe80] sm:$0xff]  ;;  %v2061_v10 = vpack.c.bf16 %v368_v3, %v364_v2  ;;  %v413_v2 = vld [vmem:[#allocation5 + $0x918] sm:$0xff] }
 0x117   :  { %1894 = vmatpush1.bf16.msra.mxu0 %v1893_v13  ;;  %v2043_v13 = vpack.c.bf16 %v337_v8, %v333_v7  ;;  %v377_v7 = vld [vmem:[#allocation5 + $0x7f8] sm:$0xff]  ;;  %v627_v8 = vld [vmem:[#allocation5 + $0xfc8] sm:$0xff] }
 0x118   :  { %1896 = vmatprep.subr.bf16.mxu0 %v1895_v21  ;;  %v590_v21 = vld [vmem:[#allocation5 + $0xea0] sm:$0xff]  ;;  %v1935_v18 = vpack.c.bf16 %v631_v9, %v627_v8  ;;  %v417_v3 = vld [vmem:[#allocation5 + $0x938] sm:$0xff] }
 0x119   :  { %2026 = vmatpush1.bf16.msra.mxu1 %v2025_v27  ;;  %v1917_v27 = vpack.c.bf16 %v590_v21, %v586_v14  ;;  %v372_v14 = vld [vmem:[#allocation5 + $0x7d0] sm:$0xff]  ;;  %v381_v21 = vld [vmem:[#allocation5 + $0x818] sm:$0xff]  ;;  %v1240_v8 = vld [vmem:[#allocation8 + $0x60] sm:$0xff] }
 0x11a   :  { %2028 = vmatprep.subr.bf16.mxu1 %v2027_v31  ;;  %v594_v31 = vld [vmem:[#allocation5 + $0xec0] sm:$0xff]  ;;  %v1242_v9 = vld [vmem:[#allocation8 + $0x70] sm:$0xff] }
 0x11b   :  { %1898 = vmatpush1.bf16.msra.mxu0 %v1897_v30  ;;  %v2047_v30 = vpack.c.bf16 %v345_v23, %v341_v22  ;;  %v385_v22 = vld [vmem:[#allocation5 + $0x838] sm:$0xff]  ;;  %v2065_v23 = vpack.c.bf16 %v376_v15, %v372_v14 }
 0x11c   :  { %1900 = vmatprep.subr.bf16.mxu0 %v1899_v35  ;;  %v598_v35 = vld [vmem:[#allocation5 + $0xee0] sm:$0xff]  ;;  %v2067_v25 = vpack.c.bf16 %v385_v22, %v381_v21  ;;  %v421_v14 = vld [vmem:[#allocation5 + $0x958] sm:$0xff]  ;;  %v420_v21 = vld [vmem:[#allocation5 + $0x950] sm:$0xff] }
 0x11d   :  { %2030 = vmatpush1.bf16.msra.mxu1 %v2029_v41  ;;  %v1921_v41 = vpack.c.bf16 %v598_v35, %v594_v31  ;;  %v393_v31 = vld [vmem:[#allocation5 + $0x878] sm:$0xff]  ;;  %v388_v35 = vld [vmem:[#allocation5 + $0x850] sm:$0xff] }
 0x11e   :  { %2032 = vmatprep.subr.bf16.mxu1 %v2031_v44  ;;  %v602_v44 = vld [vmem:[#allocation5 + $0xf00] sm:$0xff]  ;;  %v425_v15 = vld [vmem:[#allocation5 + $0x978] sm:$0xff] }
 0x11f   :  { %1902 = vmatpush1.bf16.msra.mxu0 %v1901_v43  ;;  %v2051_v43 = vpack.c.bf16 %v353_v37, %v349_v36  ;;  %v392_v36 = vld [vmem:[#allocation5 + $0x870] sm:$0xff]  ;;  %v397_v37 = vld [vmem:[#allocation5 + $0x898] sm:$0xff] }
 0x120   :  { %1904 = vmatprep.subr.bf16.mxu0 %v1903_v48  ;;  %v606_v48 = vld [vmem:[#allocation5 + $0xf20] sm:$0xff]  ;;  %v2073_v46 = vpack.c.bf16 %v392_v36, %v388_v35  ;;  %v2075_v51 = vpack.c.bf16 %v401_v38, %v397_v37  ;;  %v428_v36 = vld [vmem:[#allocation5 + $0x990] sm:$0xff] }
 0x121   :  { %2034 = vmatpush1.bf16.msra.mxu1 %v2033_v53  ;;  %v1925_v53 = vpack.c.bf16 %v606_v48, %v602_v44  ;;  %v1231_v44 = vld [vmem:[#allocation8 + $0x18] sm:$0xff]  ;;  %v1230_v48 = vld [vmem:[#allocation8 + $0x10] sm:$0xff]  ;;  %v1248_v38 = vld [vmem:[#allocation8 + $0xa0] sm:$0xff] }
 0x122   :  { %2036 = vmatprep.subr.bf16.mxu1 %v2035_v55  ;;  %v610_v55 = vld [vmem:[#allocation5 + $0xf40] sm:$0xff]  ;;  %v2197_v17 = vpack.c.bf16 %v1230_v48, %v1228_v45  ;;  %v437_v45 = vld [vmem:[#allocation5 + $0x9d8] sm:$0xff] }
 0x123   :  { %1906 = vmatpush1.bf16.msra.mxu0 %v1905_v54  ;;  %v2055_v54 = vpack.c.bf16 %v361_v50, %v357_v49  ;;  %v1233_v49 = vld [vmem:[#allocation8 + $0x28] sm:$0xff]  ;;  %v1235_v50 = vld [vmem:[#allocation8 + $0x38] sm:$0xff] }
 0x124   :  { %1908 = vmatprep.subr.bf16.mxu0 %v1907_v58  ;;  %v614_v58 = vld [vmem:[#allocation5 + $0xf60] sm:$0xff] }
 0x125   :  { %2038 = vmatpush1.bf16.msra.mxu1 %v2037_v0  ;;  %v1929_v0 = vpack.c.bf16 %v614_v58, %v610_v55  ;;  %v1237_v55 = vld [vmem:[#allocation8 + $0x48] sm:$0xff] }
 0x126   :  { %2040 = vmatprep.subr.bf16.mxu1 %v2039_v19  ;;  %v618_v19 = vld [vmem:[#allocation5 + $0xf80] sm:$0xff] }
 0x127   :  { %1910 = vmatpush1.bf16.msra.mxu0 %v1909_v1  ;;  %v2059_v1 = vpack.c.bf16 %v369_v60, %v365_v59  ;;  %v404_v60 = vld [vmem:[#allocation5 + $0x8d0] sm:$0xff] }
 0x128   :  { %1912 = vmatprep.subr.bf16.mxu0 %v1911_v5  ;;  %v622_v5 = vld [vmem:[#allocation5 + $0xfa0] sm:$0xff] }
 0x129   :  { %2042 = vmatpush1.bf16.msra.mxu1 %v2041_v11  ;;  %v1933_v11 = vpack.c.bf16 %v622_v5, %v618_v19  ;;  %v1243_v19 = vld [vmem:[#allocation8 + $0x78] sm:$0xff] }
 0x12a   :  { %2044 = vmatprep.subr.bf16.mxu1 %v2043_v13  ;;  %v626_v13 = vld [vmem:[#allocation5 + $0xfc0] sm:$0xff] }
 0x12b   :  { %1914 = vmatpush1.bf16.msra.mxu0 %v1913_v12  ;;  %v2063_v12 = vpack.c.bf16 %v377_v7, %v373_v6  ;;  %v412_v6 = vld [vmem:[#allocation5 + $0x910] sm:$0xff] }
 0x12c   :  { %1916 = vmatprep.subr.bf16.mxu0 %v1915_v20  ;;  %v630_v20 = vld [vmem:[#allocation5 + $0xfe0] sm:$0xff] }
 0x12d   :  { %2046 = vmatpush1.bf16.msra.mxu1 %v2045_v26  ;;  %v1937_v24 = vpack.c.bf16 %v630_v20, %v626_v13  ;;  %v380_v26 = vld [vmem:[#allocation5 + $0x810] sm:$0xff]  ;;  %v1247_v13 = vld [vmem:[#allocation8 + $0x98] sm:$0xff] }
 0x12e   :  { %2048 = vmatprep.subr.bf16.mxu1 %v2047_v30  ;;  %v389_v30 = vld [vmem:[#allocation5 + $0x858] sm:$0xff] }
 0x12f   :  { %1918 = vmatpush1.bf16.msra.mxu0 %v1917_v27  ;;  %v384_v27 = vld [vmem:[#allocation5 + $0x830] sm:$0xff] }
 0x130   :  { %1920 = vmatprep.subr.bf16.mxu0 %v1919_v34  ;;  %v2069_v32 = vpack.c.bf16 %v384_v27, %v380_v26  ;;  %v2071_v34 = vpack.c.bf16 %v393_v31, %v389_v30  ;;  %v424_v26 = vld [vmem:[#allocation5 + $0x970] sm:$0xff]  ;;  %v1251_v30 = vld [vmem:[#allocation8 + $0xb8] sm:$0xff] }
 0x131   :  { %2050 = vmatpush1.bf16.msra.mxu1 %v2049_v40  ;;  %v396_v40 = vld [vmem:[#allocation5 + $0x890] sm:$0xff]  ;;  %v429_v31 = vld [vmem:[#allocation5 + $0x998] sm:$0xff]  ;;  %v2089_v35 = vpack.c.bf16 %v424_v26, %v420_v21 }
 0x132   :  { %2052 = vmatprep.subr.bf16.mxu1 %v2051_v43  ;;  %v1229_v43 = vld [vmem:[#allocation8 + $0x8] sm:$0xff] }
 0x133   :  { %1922 = vmatpush1.bf16.msra.mxu0 %v1921_v41  ;;  %v400_v41 = vld [vmem:[#allocation5 + $0x8b0] sm:$0xff] }
 0x134   :  { %1924 = vmatprep.subr.bf16.mxu0 %v1923_v47  ;;  %v2195_v47 = vpack.c.bf16 %v1231_v44, %v1229_v43  ;;  %v2077_v59 = vpack.c.bf16 %v400_v41, %v396_v40  ;;  %v1249_v27 = vld [vmem:[#allocation8 + $0xa8] sm:$0xff]  ;;  %v1255_v44 = vld [vmem:[#allocation8 + $0xd8] sm:$0xff] }
 0x135   :  { %2054 = vmatpush1.bf16.msra.mxu1 %v2053_v52  ;;  %v2199_v52 = vpack.c.bf16 %v1235_v50, %v1233_v49  ;;  %v2215_v37 = vpack.c.bf16 %v1251_v30, %v1249_v27  ;;  %v432_v41 = vld [vmem:[#allocation5 + $0x9b0] sm:$0xff]  ;;  %v1271_v27 = vld [vmem:[#allocation8 + $0x158] sm:$0xff] }
 0x136   :  { %2056 = vmatprep.subr.bf16.mxu1 %v2055_v54  ;;  %v1234_v54 = vld [vmem:[#allocation8 + $0x30] sm:$0xff]  ;;  %v1253_v43 = vld [vmem:[#allocation8 + $0xc8] sm:$0xff]  ;;  %v2093_v48 = vpack.c.bf16 %v432_v41, %v428_v36 }
 0x137   :  { %1926 = vmatpush1.bf16.msra.mxu0 %v1925_v53  ;;  %v1232_v53 = vld [vmem:[#allocation8 + $0x20] sm:$0xff]  ;;  %v436_v49 = vld [vmem:[#allocation5 + $0x9d0] sm:$0xff]  ;;  %v2219_v50 = vpack.c.bf16 %v1255_v44, %v1253_v43  ;;  %v469_v30 = vld [vmem:[#allocation5 + $0xad8] sm:$0xff] }
 0x138   :  { %1928 = vmatprep.subr.bf16.mxu0 %v1927_v57  ;;  %v1239_v57 = vld [vmem:[#allocation8 + $0x58] sm:$0xff]  ;;  %v2201_v58 = vpack.c.bf16 %v1234_v54, %v1232_v53  ;;  %v440_v53 = vld [vmem:[#allocation5 + $0x9f0] sm:$0xff] }
 0x139   :  { %2058 = vmatpush1.bf16.msra.mxu1 %v2057_v63  ;;  %v2203_v61 = vpack.c.bf16 %v1239_v57, %v1237_v55  ;;  %v1238_v63 = vld [vmem:[#allocation8 + $0x50] sm:$0xff]  ;;  %v1257_v54 = vld [vmem:[#allocation8 + $0xe8] sm:$0xff]  ;;  %v1259_v55 = vld [vmem:[#allocation8 + $0xf8] sm:$0xff] }
 0x13a   :  { %2060 = vmatprep.subr.bf16.mxu1 %v2059_v1  ;;  %v1241_v1 = vld [vmem:[#allocation8 + $0x68] sm:$0xff]  ;;  %v1275_v43 = vld [vmem:[#allocation8 + $0x178] sm:$0xff] }
 0x13b   :  { %1930 = vmatpush1.bf16.msra.mxu0 %v1929_v0  ;;  %v408_v0 = vld [vmem:[#allocation5 + $0x8f0] sm:$0xff]  ;;  %v2207_v7 = vpack.c.bf16 %v1243_v19, %v1241_v1  ;;  %v1263_v1 = vld [vmem:[#allocation8 + $0x118] sm:$0xff] }
 0x13c   :  { %1932 = vmatprep.subr.bf16.mxu0 %v1931_v4  ;;  %v2205_v4 = vpack.c.bf16 %v1238_v63, %v1236_v62  ;;  %v2081_v5 = vpack.c.bf16 %v408_v0, %v404_v60  ;;  %v2223_v60 = vpack.c.bf16 %v1259_v55, %v1257_v54  ;;  %v1258_v62 = vld [vmem:[#allocation8 + $0xf0] sm:$0xff]  ;;  %v1261_v0 = vld [vmem:[#allocation8 + $0x108] sm:$0xff]  ;;  %v1279_v54 = vld [vmem:[#allocation8 + $0x198] sm:$0xff] }
 0x13d   :  { %2062 = vmatpush1.bf16.msra.mxu1 %v2061_v10  ;;  %v2083_v10 = vpack.c.bf16 %v417_v3, %v413_v2  ;;  %v453_v19 = vld [vmem:[#allocation5 + $0xa58] sm:$0xff]  ;;  %v1269_v26 = vld [vmem:[#allocation8 + $0x148] sm:$0xff] }
 0x13e   :  { %2064 = vmatprep.subr.bf16.mxu1 %v2063_v12  ;;  %v1245_v12 = vld [vmem:[#allocation8 + $0x88] sm:$0xff]  ;;  %v457_v2 = vld [vmem:[#allocation5 + $0xa78] sm:$0xff]  ;;  %v2235_v36 = vpack.c.bf16 %v1271_v27, %v1269_v26 }
 0x13f   :  { %1934 = vmatpush1.bf16.msra.mxu0 %v1933_v11  ;;  %v416_v11 = vld [vmem:[#allocation5 + $0x930] sm:$0xff]  ;;  %v2211_v22 = vpack.c.bf16 %v1247_v13, %v1245_v12  ;;  %v1267_v12 = vld [vmem:[#allocation8 + $0x138] sm:$0xff] }
 0x140   :  { %1936 = vmatprep.subr.bf16.mxu0 %v1935_v18  ;;  %v2209_v18 = vpack.c.bf16 %v1242_v9, %v1240_v8  ;;  %v2085_v20 = vpack.c.bf16 %v416_v11, %v412_v6  ;;  %v2227_v6 = vpack.c.bf16 %v1263_v1, %v1261_v0  ;;  %v1262_v8 = vld [vmem:[#allocation8 + $0x110] sm:$0xff]  ;;  %v2103_v9 = vpack.c.bf16 %v457_v2, %v453_v19  ;;  %v1265_v11 = vld [vmem:[#allocation8 + $0x128] sm:$0xff]  ;;  %v1283_v0 = vld [vmem:[#allocation8 + $0x1b8] sm:$0xff] }
 0x141   :  { %2066 = vmatpush1.bf16.msra.mxu1 %v2065_v23  ;;  %v1244_v23 = vld [vmem:[#allocation8 + $0x80] sm:$0xff]  ;;  %v461_v13 = vld [vmem:[#allocation5 + $0xa98] sm:$0xff]  ;;  %v2231_v21 = vpack.c.bf16 %v1267_v12, %v1265_v11  ;;  %v1273_v41 = vld [vmem:[#allocation8 + $0x168] sm:$0xff] }
 0x142   :  { %2068 = vmatprep.subr.bf16.mxu1 %v2067_v25  ;;  %v2087_v25 = vpack.c.bf16 %v425_v15, %v421_v14  ;;  %v465_v14 = vld [vmem:[#allocation5 + $0xab8] sm:$0xff]  ;;  %v508_v27 = vld [vmem:[#allocation5 + $0xc10] sm:$0xff] }
 0x143   :  { %1938 = vmatpush1.bf16.msra.mxu0 %v1937_v24  ;;  %v1246_v24 = vld [vmem:[#allocation8 + $0x90] sm:$0xff]  ;;  %v1287_v11 = vld [vmem:[#allocation8 + $0x1d8] sm:$0xff] }
 0x144   :  { %1076 = vmatmul.mubr.f32.vlgmr.msra.gmra.mrb[2].mxu1 %v2393_v39  ;;  %2196 = vmatprep.subr.bf16.mxu0 %v2195_v47  ;;  %v1250_v39 = vld [vmem:[#allocation8 + $0xb0] sm:$0xff] }
 0x145   :  { %2070 = vmatpush1.bf16.msra.mxu1 %v2069_v32  ;;  %1146 = vmatprep.mubr.f32.mxu1 %v2728_v28  ;;  %v2079_v28 = vpack.c.bf16 %v409_v56, %v405_v16  ;;  %v433_v32 = vld [vmem:[#allocation5 + $0x9b8] sm:$0xff]  ;;  %v2217_v47 = vpack.c.bf16 %v1250_v39, %v1248_v38 }
 0x146   :  { %934 = vmatmul.mubr.f32.vlgmr.msra.gmra.mrb[0].mxu0 %v2739_v33  ;;  %2072 = vmatprep.subr.bf16.mxu1 %v2071_v34  ;;  %v2213_v34 = vpack.c.bf16 %v1246_v24, %v1244_v23  ;;  %v2091_v40 = vpack.c.bf16 %v433_v32, %v429_v31  ;;  %v445_v16 = vld [vmem:[#allocation5 + $0xa18] sm:$0xff]  ;;  %v2107_v24 = vpack.c.bf16 %v465_v14, %v461_v13 }
 0x147   :  { %2198 = vmatpush1.bf16.msra.mxu0 %v2197_v17  ;;  %v1254_v17 = vld [vmem:[#allocation8 + $0xd0] sm:$0xff] }
 0x148   :  { %2200 = vmatprep.subr.bf16.mxu0 %v2199_v52  ;;  %v449_v56 = vld [vmem:[#allocation5 + $0xa38] sm:$0xff] }
 0x149   :  { %2074 = vmatpush1.bf16.msra.mxu1 %v2073_v46  ;;  %v441_v46 = vld [vmem:[#allocation5 + $0x9f8] sm:$0xff]  ;;  %v2099_v63 = vpack.c.bf16 %v449_v56, %v445_v16 }
 0x14a   :  { %2076 = vmatprep.subr.bf16.mxu1 %v2075_v51  ;;  %v1252_v51 = vld [vmem:[#allocation8 + $0xc0] sm:$0xff]  ;;  %v2095_v52 = vpack.c.bf16 %v441_v46, %v437_v45  ;;  %v1266_v23 = vld [vmem:[#allocation8 + $0x130] sm:$0xff] }
 0x14b   :  { %2202 = vmatpush1.bf16.msra.mxu0 %v2201_v58  ;;  %v2221_v57 = vpack.c.bf16 %v1254_v17, %v1252_v51  ;;  %v2097_v58 = vpack.c.bf16 %v440_v53, %v436_v49  ;;  %v473_v31 = vld [vmem:[#allocation5 + $0xaf8] sm:$0xff]  ;;  %v2239_v49 = vpack.c.bf16 %v1275_v43, %v1273_v41  ;;  %v1277_v53 = vld [vmem:[#allocation8 + $0x188] sm:$0xff] }
 0x14c   :  { %2204 = vmatprep.subr.bf16.mxu0 %v2203_v61  ;;  %v1256_v61 = vld [vmem:[#allocation8 + $0xe0] sm:$0xff]  ;;  %v1270_v38 = vld [vmem:[#allocation8 + $0x150] sm:$0xff]  ;;  %v2111_v39 = vpack.c.bf16 %v473_v31, %v469_v30 }
 0x14d   :  { %2078 = vmatpush1.bf16.msra.mxu1 %v2077_v59  ;;  %v444_v59 = vld [vmem:[#allocation5 + $0xa10] sm:$0xff]  ;;  %v2225_v3 = vpack.c.bf16 %v1258_v62, %v1256_v61  ;;  %v477_v44 = vld [vmem:[#allocation5 + $0xb18] sm:$0xff] }
 0x14e   :  { %2080 = vmatprep.subr.bf16.mxu1 %v2079_v28  ;;  %v448_v28 = vld [vmem:[#allocation5 + $0xa30] sm:$0xff]  ;;  %v481_v45 = vld [vmem:[#allocation5 + $0xb38] sm:$0xff] }
 0x14f   :  { %2206 = vmatpush1.bf16.msra.mxu0 %v2205_v4  ;;  %v2101_v4 = vpack.c.bf16 %v448_v28, %v444_v59  ;;  %v1274_v51 = vld [vmem:[#allocation8 + $0x170] sm:$0xff]  ;;  %v2115_v17 = vpack.c.bf16 %v481_v45, %v477_v44  ;;  %v2243_v59 = vpack.c.bf16 %v1279_v54, %v1277_v53  ;;  %v1281_v28 = vld [vmem:[#allocation8 + $0x1a8] sm:$0xff] }
 0x150   :  { %2208 = vmatprep.subr.bf16.mxu0 %v2207_v7  ;;  %v1260_v7 = vld [vmem:[#allocation8 + $0x100] sm:$0xff]  ;;  %v485_v55 = vld [vmem:[#allocation5 + $0xb58] sm:$0xff]  ;;  %v512_v30 = vld [vmem:[#allocation5 + $0xc30] sm:$0xff] }
 0x151   :  { %2082 = vmatpush1.bf16.msra.mxu1 %v2081_v5  ;;  %v452_v5 = vld [vmem:[#allocation5 + $0xa50] sm:$0xff]  ;;  %v2229_v15 = vpack.c.bf16 %v1262_v8, %v1260_v7  ;;  %v489_v16 = vld [vmem:[#allocation5 + $0xb78] sm:$0xff] }
 0x152   :  { %2084 = vmatprep.subr.bf16.mxu1 %v2083_v10  ;;  %v456_v10 = vld [vmem:[#allocation5 + $0xa70] sm:$0xff]  ;;  %v2119_v62 = vpack.c.bf16 %v489_v16, %v485_v55  ;;  %v493_v1 = vld [vmem:[#allocation5 + $0xb98] sm:$0xff] }
 0x153   :  { %2210 = vmatpush1.bf16.msra.mxu0 %v2209_v18  ;;  %v2105_v18 = vpack.c.bf16 %v456_v10, %v452_v5  ;;  %v1278_v61 = vld [vmem:[#allocation8 + $0x190] sm:$0xff]  ;;  %v2247_v5 = vpack.c.bf16 %v1283_v0, %v1281_v28  ;;  %v1285_v10 = vld [vmem:[#allocation8 + $0x1c8] sm:$0xff] }
 0x154   :  { %2212 = vmatprep.subr.bf16.mxu0 %v2211_v22  ;;  %v1264_v22 = vld [vmem:[#allocation8 + $0x120] sm:$0xff]  ;;  %v497_v19 = vld [vmem:[#allocation5 + $0xbb8] sm:$0xff]  ;;  %v524_v43 = vld [vmem:[#allocation5 + $0xc90] sm:$0xff] }
 0x155   :  { %2086 = vmatpush1.bf16.msra.mxu1 %v2085_v20  ;;  %v460_v20 = vld [vmem:[#allocation5 + $0xa90] sm:$0xff]  ;;  %v2233_v32 = vpack.c.bf16 %v1266_v23, %v1264_v22  ;;  %v2123_v8 = vpack.c.bf16 %v497_v19, %v493_v1  ;;  %v501_v12 = vld [vmem:[#allocation5 + $0xbd8] sm:$0xff] }
 0x156   :  { %2088 = vmatprep.subr.bf16.mxu1 %v2087_v25  ;;  %v464_v25 = vld [vmem:[#allocation5 + $0xab0] sm:$0xff]  ;;  %v505_v13 = vld [vmem:[#allocation5 + $0xbf8] sm:$0xff] }
 0x157   :  { %2214 = vmatpush1.bf16.msra.mxu0 %v2213_v34  ;;  %v2109_v34 = vpack.c.bf16 %v464_v25, %v460_v20  ;;  %v1282_v7 = vld [vmem:[#allocation8 + $0x1b0] sm:$0xff]  ;;  %v2127_v20 = vpack.c.bf16 %v505_v13, %v501_v12 }
 0x158   :  { %2216 = vmatprep.subr.bf16.mxu0 %v2215_v37  ;;  %v1268_v37 = vld [vmem:[#allocation8 + $0x140] sm:$0xff]  ;;  %v504_v22 = vld [vmem:[#allocation5 + $0xbf0] sm:$0xff]  ;;  %v509_v23 = vld [vmem:[#allocation5 + $0xc18] sm:$0xff] }
 0x159   :  { %2090 = vmatpush1.bf16.msra.mxu1 %v2089_v35  ;;  %v468_v35 = vld [vmem:[#allocation5 + $0xad0] sm:$0xff]  ;;  %v2237_v46 = vpack.c.bf16 %v1270_v38, %v1268_v37  ;;  %v517_v31 = vld [vmem:[#allocation5 + $0xc58] sm:$0xff] }
 0x15a   :  { %2092 = vmatprep.subr.bf16.mxu1 %v2091_v40  ;;  %v472_v40 = vld [vmem:[#allocation5 + $0xaf0] sm:$0xff]  ;;  %v525_v38 = vld [vmem:[#allocation5 + $0xc98] sm:$0xff] }
 0x15b   :  { %2218 = vmatpush1.bf16.msra.mxu0 %v2217_v47  ;;  %v2113_v47 = vpack.c.bf16 %v472_v40, %v468_v35  ;;  %v520_v37 = vld [vmem:[#allocation5 + $0xc70] sm:$0xff]  ;;  %v533_v45 = vld [vmem:[#allocation5 + $0xcd8] sm:$0xff] }
 0x15c   :  { %2220 = vmatprep.subr.bf16.mxu0 %v2219_v50  ;;  %v1272_v50 = vld [vmem:[#allocation8 + $0x160] sm:$0xff]  ;;  %v528_v44 = vld [vmem:[#allocation5 + $0xcb0] sm:$0xff]  ;;  %v549_v54 = vld [vmem:[#allocation5 + $0xd58] sm:$0xff] }
 0x15d   :  { %2094 = vmatpush1.bf16.msra.mxu1 %v2093_v48  ;;  %v476_v48 = vld [vmem:[#allocation5 + $0xb10] sm:$0xff]  ;;  %v2241_v56 = vpack.c.bf16 %v1274_v51, %v1272_v50  ;;  %v541_v51 = vld [vmem:[#allocation5 + $0xd18] sm:$0xff] }
 0x15e   :  { %2096 = vmatprep.subr.bf16.mxu1 %v2095_v52  ;;  %v480_v52 = vld [vmem:[#allocation5 + $0xb30] sm:$0xff]  ;;  %v553_v55 = vld [vmem:[#allocation5 + $0xd78] sm:$0xff] }
 0x15f   :  { %2222 = vmatpush1.bf16.msra.mxu0 %v2221_v57  ;;  %v2117_v57 = vpack.c.bf16 %v480_v52, %v476_v48  ;;  %v536_v50 = vld [vmem:[#allocation5 + $0xcf0] sm:$0xff] }
 0x160   :  { %2224 = vmatprep.subr.bf16.mxu0 %v2223_v60  ;;  %v1276_v60 = vld [vmem:[#allocation8 + $0x180] sm:$0xff]  ;;  %v540_v53 = vld [vmem:[#allocation5 + $0xd10] sm:$0xff] }
 0x161   :  { %2098 = vmatpush1.bf16.msra.mxu1 %v2097_v58  ;;  %v484_v58 = vld [vmem:[#allocation5 + $0xb50] sm:$0xff]  ;;  %v2245_v2 = vpack.c.bf16 %v1278_v61, %v1276_v60  ;;  %v561_v60 = vld [vmem:[#allocation5 + $0xdb8] sm:$0xff] }
 0x162   :  { %2100 = vmatprep.subr.bf16.mxu1 %v2099_v63  ;;  %v488_v63 = vld [vmem:[#allocation5 + $0xb70] sm:$0xff] }
 0x163   :  { %2226 = vmatpush1.bf16.msra.mxu0 %v2225_v3  ;;  %v2121_v3 = vpack.c.bf16 %v488_v63, %v484_v58  ;;  %v552_v58 = vld [vmem:[#allocation5 + $0xd70] sm:$0xff] }
 0x164   :  { %2228 = vmatprep.subr.bf16.mxu0 %v2227_v6  ;;  %v1280_v6 = vld [vmem:[#allocation8 + $0x1a0] sm:$0xff]  ;;  %v1286_v63 = vld [vmem:[#allocation8 + $0x1d0] sm:$0xff] }
 0x165   :  { %2102 = vmatpush1.bf16.msra.mxu1 %v2101_v4  ;;  %v492_v4 = vld [vmem:[#allocation5 + $0xb90] sm:$0xff]  ;;  %v2249_v14 = vpack.c.bf16 %v1282_v7, %v1280_v6  ;;  %v1291_v7 = vld [vmem:[#allocation8 + $0x1f8] sm:$0xff] }
 0x166   :  { %2104 = vmatprep.subr.bf16.mxu1 %v2103_v9  ;;  %v496_v9 = vld [vmem:[#allocation5 + $0xbb0] sm:$0xff] }
 0x167   :  { %2230 = vmatpush1.bf16.msra.mxu0 %v2229_v15  ;;  %v2125_v15 = vpack.c.bf16 %v496_v9, %v492_v4  ;;  %v556_v0 = vld [vmem:[#allocation5 + $0xd90] sm:$0xff]  ;;  %v569_v4 = vld [vmem:[#allocation5 + $0xdf8] sm:$0xff] }
 0x168   :  { %2232 = vmatprep.subr.bf16.mxu0 %v2231_v21  ;;  %v500_v21 = vld [vmem:[#allocation5 + $0xbd0] sm:$0xff] }
 0x169   :  { %2106 = vmatpush1.bf16.msra.mxu1 %v2105_v18  ;;  %v2251_v18 = vpack.c.bf16 %v1287_v11, %v1285_v10  ;;  %v2129_v25 = vpack.c.bf16 %v504_v22, %v500_v21  ;;  %v560_v1 = vld [vmem:[#allocation5 + $0xdb0] sm:$0xff]  ;;  %v1288_v10 = vld [vmem:[#allocation8 + $0x1e0] sm:$0xff] }
 0x16a   :  { %2108 = vmatprep.subr.bf16.mxu1 %v2107_v24  ;;  %v513_v24 = vld [vmem:[#allocation5 + $0xc38] sm:$0xff]  ;;  %v1289_v6 = vld [vmem:[#allocation8 + $0x1e8] sm:$0xff] }
 0x16b   :  { %2234 = vmatpush1.bf16.msra.mxu0 %v2233_v32  ;;  %v2131_v26 = vpack.c.bf16 %v513_v24, %v509_v23  ;;  %v521_v32 = vld [vmem:[#allocation5 + $0xc78] sm:$0xff]  ;;  %v2255_v9 = vpack.c.bf16 %v1291_v7, %v1289_v6  ;;  %v564_v13 = vld [vmem:[#allocation5 + $0xdd0] sm:$0xff]  ;;  %v636_v7 = vlaneseq }
 0x16c   :  { %2236 = vmatprep.subr.bf16.mxu0 %v2235_v36  ;;  %v2135_v35 = vpack.c.bf16 %v521_v32, %v517_v31  ;;  %v516_v36 = vld [vmem:[#allocation5 + $0xc50] sm:$0xff] }
 0x16d   :  { %2110 = vmatpush1.bf16.msra.mxu1 %v2109_v34  ;;  %v2133_v34 = vpack.c.bf16 %v512_v30, %v508_v27  ;;  %v2137_v40 = vpack.c.bf16 %v520_v37, %v516_v36  ;;  %v1290_v11 = vld [vmem:[#allocation8 + $0x1f0] sm:$0xff]  ;;  %v1293_v27 = vld [vmem:[#allocation8 + $0x208] sm:$0xff]  ;;  %v1295_v30 = vld [vmem:[#allocation8 + $0x218] sm:$0xff] }
 0x16e   :  { %2112 = vmatprep.subr.bf16.mxu1 %v2111_v39  ;;  %v529_v39 = vld [vmem:[#allocation5 + $0xcb8] sm:$0xff]  ;;  %v572_v23 = vld [vmem:[#allocation5 + $0xe10] sm:$0xff]  ;;  %v2259_v31 = vpack.c.bf16 %v1295_v30, %v1293_v27  ;;  %v1296_v30 = vld [vmem:[#allocation8 + $0x220] sm:$0xff] }
 0x16f   :  { %2238 = vmatpush1.bf16.msra.mxu0 %v2237_v46  ;;  %v2139_v41 = vpack.c.bf16 %v529_v39, %v525_v38  ;;  %v537_v46 = vld [vmem:[#allocation5 + $0xcf8] sm:$0xff]  ;;  %v576_v24 = vld [vmem:[#allocation5 + $0xe30] sm:$0xff] }
 0x170   :  { %2240 = vmatprep.subr.bf16.mxu0 %v2239_v49  ;;  %v2143_v48 = vpack.c.bf16 %v537_v46, %v533_v45  ;;  %v532_v49 = vld [vmem:[#allocation5 + $0xcd0] sm:$0xff]  ;;  %v2165_v32 = vpack.c.bf16 %v576_v24, %v572_v23  ;;  %v589_v37 = vld [vmem:[#allocation5 + $0xe98] sm:$0xff] }
 0x171   :  { %2114 = vmatpush1.bf16.msra.mxu1 %v2113_v47  ;;  %v2141_v47 = vpack.c.bf16 %v528_v44, %v524_v43  ;;  %v584_v36 = vld [vmem:[#allocation5 + $0xe70] sm:$0xff]  ;;  %v593_v38 = vld [vmem:[#allocation5 + $0xeb8] sm:$0xff] }
 0x172   :  { %2116 = vmatprep.subr.bf16.mxu1 %v2115_v17  ;;  %v545_v17 = vld [vmem:[#allocation5 + $0xd38] sm:$0xff]  ;;  %v592_v43 = vld [vmem:[#allocation5 + $0xeb0] sm:$0xff] }
 0x173   :  { %2242 = vmatpush1.bf16.msra.mxu0 %v2241_v56  ;;  %v2147_v52 = vpack.c.bf16 %v545_v17, %v541_v51  ;;  %v2151_v56 = vpack.c.bf16 %v553_v55, %v549_v54  ;;  %v597_v44 = vld [vmem:[#allocation5 + $0xed8] sm:$0xff]  ;;  %v1297_v24 = vld [vmem:[#allocation8 + $0x228] sm:$0xff] }
 0x174   :  { %2244 = vmatprep.subr.bf16.mxu0 %v2243_v59  ;;  %v557_v59 = vld [vmem:[#allocation5 + $0xd98] sm:$0xff] }
 0x175   :  { %2118 = vmatpush1.bf16.msra.mxu1 %v2117_v57  ;;  %v548_v57 = vld [vmem:[#allocation5 + $0xd50] sm:$0xff]  ;;  %v2155_v28 = vpack.c.bf16 %v561_v60, %v557_v59  ;;  %v601_v45 = vld [vmem:[#allocation5 + $0xef8] sm:$0xff] }
 0x176   :  { %2120 = vmatprep.subr.bf16.mxu1 %v2119_v62  ;;  %v2153_v61 = vpack.c.bf16 %v552_v58, %v548_v57  ;;  %v1284_v62 = vld [vmem:[#allocation8 + $0x1c0] sm:$0xff]  ;;  %v609_v51 = vld [vmem:[#allocation5 + $0xf38] sm:$0xff]  ;;  %v616_v57 = vld [vmem:[#allocation5 + $0xf70] sm:$0xff] }
 0x177   :  { %2246 = vmatpush1.bf16.msra.mxu0 %v2245_v2  ;;  %v2253_v19 = vpack.c.bf16 %v1286_v63, %v1284_v62  ;;  %v617_v54 = vld [vmem:[#allocation5 + $0xf78] sm:$0xff]  ;;  %v620_v62 = vld [vmem:[#allocation5 + $0xf90] sm:$0xff] }
 0x178   :  { %2248 = vmatprep.subr.bf16.mxu0 %v2247_v5  ;;  %v621_v58 = vld [vmem:[#allocation5 + $0xf98] sm:$0xff]  ;;  %v624_v63 = vld [vmem:[#allocation5 + $0xfb0] sm:$0xff] }
 0x179   :  { %2122 = vmatpush1.bf16.msra.mxu1 %v2121_v3  ;;  %v565_v3 = vld [vmem:[#allocation5 + $0xdd8] sm:$0xff] }
 0x17a   :  { %2124 = vmatprep.subr.bf16.mxu1 %v2123_v8  ;;  %v2157_v8 = vpack.c.bf16 %v560_v1, %v556_v0  ;;  %v2159_v12 = vpack.c.bf16 %v569_v4, %v565_v3  ;;  %v625_v59 = vld [vmem:[#allocation5 + $0xfb8] sm:$0xff]  ;;  %v2189_v1 = vpack.c.bf16 %v624_v63, %v620_v62  ;;  %v628_v3 = vld [vmem:[#allocation5 + $0xfd0] sm:$0xff] }
 0x17b   :  { %2250 = vmatpush1.bf16.msra.mxu0 %v2249_v14  ;;  %v568_v14 = vld [vmem:[#allocation5 + $0xdf0] sm:$0xff]  ;;  %v633_v0 = vld [vmem:[#allocation5 + $0xff8] sm:$0xff] }
 0x17c   :  { %2252 = vmatprep.subr.bf16.mxu0 %v2251_v18  ;;  %v573_v18 = vld [vmem:[#allocation5 + $0xe18] sm:$0xff]  ;;  %v2161_v21 = vpack.c.bf16 %v568_v14, %v564_v13  ;;  %v632_v4 = vld [vmem:[#allocation5 + $0xff0] sm:$0xff] }
 0x17d   :  { %2126 = vmatpush1.bf16.msra.mxu1 %v2125_v15  ;;  %v2257_v15 = vpack.c.bf16 %v1290_v11, %v1288_v10  ;;  %v2193_v6 = vpack.c.bf16 %v632_v4, %v628_v3  ;;  %v2753_v10 = vld [vmem:[#allocation7] sm:$0xf]  ;;  %v1536_v3 = vld [vmem:[#allocation11 + $0xc0] sm:$0xff]  ;;  %v1537_v4 = vld [vmem:[#allocation11 + $0xc8] sm:$0xff] }
 0x17e   :  { %2128 = vmatprep.subr.bf16.mxu1 %v2127_v20  ;;  %v577_v20 = vld [vmem:[#allocation5 + $0xe38] sm:$0xff] }
 0x17f   :  { %2254 = vmatpush1.bf16.msra.mxu0 %v2253_v19  ;;  %v2163_v22 = vpack.c.bf16 %v577_v20, %v573_v18  ;;  %v1311_v62 = vld [vmem:[#allocation8 + $0x298] sm:$0xff] }
 0x180   :  { %2256 = vmatprep.subr.bf16.mxu0 %v2255_v9 }
 0x181   :  { %2130 = vmatpush1.bf16.msra.mxu1 %v2129_v25  ;;  %v581_v25 = vld [vmem:[#allocation5 + $0xe58] sm:$0xff] }
 0x182   :  { %2132 = vmatprep.subr.bf16.mxu1 %v2131_v26  ;;  %v585_v26 = vld [vmem:[#allocation5 + $0xe78] sm:$0xff] }
 0x183   :  { %2258 = vmatpush1.bf16.msra.mxu0 %v2257_v15 }
 0x184   :  { %1147 = vmatmul.mubr.f32.vlgmr.msra.gmra.mrb[2].mxu1 %v2731_v29  ;;  %v2145_v29 = vpack.c.bf16 %v536_v50, %v532_v49  ;;  %2260 = vmatprep.subr.bf16.mxu0 %v2259_v31  ;;  %v600_v49 = vld [vmem:[#allocation5 + $0xef0] sm:$0xff]  ;;  %v605_v50 = vld [vmem:[#allocation5 + $0xf18] sm:$0xff] }
 0x185   :  { %2134 = vmatpush1.bf16.msra.mxu1 %v2133_v34  ;;  %1217 = vmatprep.mubr.f32.mxu1 %v2734_v42  ;;  %v544_v42 = vld [vmem:[#allocation5 + $0xd30] sm:$0xff]  ;;  %v2167_v34 = vpack.c.bf16 %v585_v26, %v581_v25  ;;  %v1299_v25 = vld [vmem:[#allocation8 + $0x238] sm:$0xff] }
 0x186   :  { %2136 = vmatprep.subr.bf16.mxu1 %v2135_v35  ;;  %v2149_v16 = vpack.c.bf16 %v544_v42, %v540_v53  ;;  %v580_v35 = vld [vmem:[#allocation5 + $0xe50] sm:$0xff]  ;;  %v613_v42 = vld [vmem:[#allocation5 + $0xf58] sm:$0xff] }
 0x187   :  { %v2169_v39 = vpack.c.bf16 %v584_v36, %v580_v35  ;;  %v608_v53 = vld [vmem:[#allocation5 + $0xf30] sm:$0xff]  ;;  %v1303_v36 = vld [vmem:[#allocation8 + $0x258] sm:$0xff] }
 0x188   :  { %v1301_v35 = vld [vmem:[#allocation8 + $0x248] sm:$0xff] }
 0x189   :  { %2138 = vmatpush1.bf16.msra.mxu1 %v2137_v40  ;;  %v2171_v40 = vpack.c.bf16 %v593_v38, %v589_v37  ;;  %v1529_v37 = vld [vmem:[#allocation11 + $0x88] sm:$0xff] }
 0x18a   :  { %2140 = vmatprep.subr.bf16.mxu1 %v2139_v41  ;;  %v588_v41 = vld [vmem:[#allocation5 + $0xe90] sm:$0xff] }
 0x18b   :  { %v2173_v46 = vpack.c.bf16 %v592_v43, %v588_v41  ;;  %v1531_v41 = vld [vmem:[#allocation11 + $0x98] sm:$0xff] }
 0x18d   :  { %2142 = vmatpush1.bf16.msra.mxu1 %v2141_v47  ;;  %v2175_v47 = vpack.c.bf16 %v601_v45, %v597_v44 }
 0x18e   :  { %2144 = vmatprep.subr.bf16.mxu1 %v2143_v48  ;;  %v596_v48 = vld [vmem:[#allocation5 + $0xed0] sm:$0xff] }
 0x18f   :  { %v2177_v17 = vpack.c.bf16 %v600_v49, %v596_v48  ;;  %v1532_v48 = vld [vmem:[#allocation11 + $0xa0] sm:$0xff]  ;;  %v2267_v49 = vpack.c.bf16 %v1303_v36, %v1301_v35  ;;  %v1523_v35 = vld [vmem:[#allocation11 + $0x58] sm:$0xff] }
 0x191   :  { %2146 = vmatpush1.bf16.msra.mxu1 %v2145_v29  ;;  %v2179_v29 = vpack.c.bf16 %v609_v51, %v605_v50  ;;  %v1300_v50 = vld [vmem:[#allocation8 + $0x240] sm:$0xff]  ;;  %v1302_v51 = vld [vmem:[#allocation8 + $0x250] sm:$0xff] }
 0x192   :  { %2148 = vmatprep.subr.bf16.mxu1 %v2147_v52  ;;  %v604_v52 = vld [vmem:[#allocation5 + $0xf10] sm:$0xff] }
 0x193   :  { %v2181_v55 = vpack.c.bf16 %v608_v53, %v604_v52  ;;  %v1307_v52 = vld [vmem:[#allocation8 + $0x278] sm:$0xff] }
 0x195   :  { %2150 = vmatpush1.bf16.msra.mxu1 %v2149_v16  ;;  %v2183_v16 = vpack.c.bf16 %v617_v54, %v613_v42  ;;  %v1516_v54 = vld [vmem:[#allocation11 + $0x20] sm:$0xff] }
 0x196   :  { %2152 = vmatprep.subr.bf16.mxu1 %v2151_v56  ;;  %v612_v56 = vld [vmem:[#allocation5 + $0xf50] sm:$0xff] }
 0x197   :  { %v2745_v2 = vpop.f32.mrb[0].mxu1  ;;  %v2185_v60 = vpack.c.bf16 %v616_v57, %v612_v56  ;;  %v1534_v56 = vld [vmem:[#allocation11 + $0xb0] sm:$0xff]  ;;  %v1535_v57 = vld [vmem:[#allocation11 + $0xb8] sm:$0xff] }
 0x198   :  { %v2747_v5 = vpop.f32.mrb[1].mxu1 }
 0x199   :  { %2154 = vmatpush1.bf16.msra.mxu1 %v2153_v61  ;;  %v2187_v61 = vpack.c.bf16 %v625_v59, %v621_v58  ;;  %v1304_v59 = vld [vmem:[#allocation8 + $0x260] sm:$0xff] }
 0x19a   :  { %2156 = vmatprep.subr.bf16.mxu1 %v2155_v28  ;;  %v629_v28 = vld [vmem:[#allocation5 + $0xfd8] sm:$0xff] }
 0x19b   :  { %v2191_v19 = vpack.c.bf16 %v633_v0, %v629_v28  ;;  %v2335_v28 = vpack.c.bf16 %v1535_v57, %v1534_v56  ;;  %v1518_v0 = vld [vmem:[#allocation11 + $0x30] sm:$0xff]  ;;  %v1333_v57 = vld [vmem:[#allocation8 + $0x348] sm:$0xff] }
 0x19c   :  { %v1330_v56 = vld [vmem:[#allocation8 + $0x330] sm:$0xff] }
 0x19d   :  { %2158 = vmatpush1.bf16.msra.mxu1 %v2157_v8  ;;  %v2750_v8 = vshrl.u32 %v636_v7, 7  ;;  %v1308_v7 = vld [vmem:[#allocation8 + $0x280] sm:$0xff] }
 0x19e   :  { %2160 = vmatprep.subr.bf16.mxu1 %v2159_v12 }
 0x19f   :  { %v638_v9 = vsub.s32 0, %v2750_v8  ;;  %v642_v11 = vsub.s32 1, %v2750_v8 }
 0x1a1   :  { %2162 = vmatpush1.bf16.msra.mxu1 %v2161_v21  ;;  %v639_v12 = vrot.slane %v2753_v10, %v638_v9  ;;  %v643_v13 = vrot.slane %v2753_v10, %v642_v11  ;;  %v1292_v21 = vld [vmem:[#allocation8 + $0x200] sm:$0xff] }
 0x1a2   :  { %2164 = vmatprep.subr.bf16.mxu1 %v2163_v22  ;;  %v1294_v22 = vld [vmem:[#allocation8 + $0x210] sm:$0xff] }
 0x1a3   :  { %v723_v14 = vadd.f32 %v2745_v2, %v639_v12  ;;  %v2261_v27 = vpack.c.bf16 %v1294_v22, %v1292_v21  ;;  %v1528_v2 = vld [vmem:[#allocation11 + $0x80] sm:$0xff]  ;;  %v1310_v12 = vld [vmem:[#allocation8 + $0x290] sm:$0xff] }
 0x1a4   :  { %v2323_v38 = vpack.c.bf16 %v1529_v37, %v1528_v2  ;;  %v2277_v21 = vpack.c.bf16 %v1310_v12, %v1308_v7  ;;  %v1538_v22 = vld [vmem:[#allocation11 + $0xd0] sm:$0xff]  ;;  %v1540_v2 = vld [vmem:[#allocation11 + $0xe0] sm:$0xff]  ;;  %v1541_v37 = vld [vmem:[#allocation11 + $0xe8] sm:$0xff] }
 0x1a5   :  { %2166 = vmatpush1.bf16.msra.mxu1 %v2165_v32  ;;  %v2263_v32 = vpack.c.bf16 %v1299_v25, %v1297_v24  ;;  %v1312_v25 = vld [vmem:[#allocation8 + $0x2a0] sm:$0xff] }
 0x1a6   :  { %2168 = vmatprep.subr.bf16.mxu1 %v2167_v34  ;;  %v1298_v34 = vld [vmem:[#allocation8 + $0x230] sm:$0xff] }
 0x1a7   :  { %v2265_v43 = vpack.c.bf16 %v1298_v34, %v1296_v30  ;;  %v1319_v30 = vld [vmem:[#allocation8 + $0x2d8] sm:$0xff] }
 0x1a8   :  { %v1522_v34 = vld [vmem:[#allocation11 + $0x50] sm:$0xff] }
 0x1a9   :  { %2170 = vmatpush1.bf16.msra.mxu1 %v2169_v39  ;;  %v1513_v39 = vld [vmem:[#allocation11 + $0x8] sm:$0xff] }
 0x1aa   :  { %2172 = vmatprep.subr.bf16.mxu1 %v2171_v40  ;;  %v1530_v40 = vld [vmem:[#allocation11 + $0x90] sm:$0xff] }
 0x1ab   :  { %v2327_v45 = vpack.c.bf16 %v1531_v41, %v1530_v40  ;;  %v1321_v40 = vld [vmem:[#allocation8 + $0x2e8] sm:$0xff]  ;;  %v1323_v41 = vld [vmem:[#allocation8 + $0x2f8] sm:$0xff] }
 0x1ad   :  { %2174 = vmatpush1.bf16.msra.mxu1 %v2173_v46  ;;  %v1514_v46 = vld [vmem:[#allocation11 + $0x10] sm:$0xff] }
 0x1ae   :  { %2176 = vmatprep.subr.bf16.mxu1 %v2175_v47  ;;  %v1515_v47 = vld [vmem:[#allocation11 + $0x18] sm:$0xff] }
 0x1af   :  { %v2329_v53 = vpack.c.bf16 %v1515_v47, %v1514_v46  ;;  %v2287_v46 = vpack.c.bf16 %v1323_v41, %v1321_v40  ;;  %v1320_v47 = vld [vmem:[#allocation8 + $0x2e0] sm:$0xff] }
 0x1b1   :  { %2178 = vmatpush1.bf16.msra.mxu1 %v2177_v17  ;;  %v1533_v17 = vld [vmem:[#allocation11 + $0xa8] sm:$0xff] }
 0x1b2   :  { %2180 = vmatprep.subr.bf16.mxu1 %v2179_v29  ;;  %v1305_v29 = vld [vmem:[#allocation8 + $0x268] sm:$0xff]  ;;  %v2331_v42 = vpack.c.bf16 %v1533_v17, %v1532_v48  ;;  %v1322_v48 = vld [vmem:[#allocation8 + $0x2f0] sm:$0xff] }
 0x1b3   :  { %v2271_v58 = vpack.c.bf16 %v1307_v52, %v1305_v29  ;;  %v1324_v29 = vld [vmem:[#allocation8 + $0x300] sm:$0xff]  ;;  %v1326_v52 = vld [vmem:[#allocation8 + $0x310] sm:$0xff] }
 0x1b5   :  { %2182 = vmatpush1.bf16.msra.mxu1 %v2181_v55  ;;  %v1517_v55 = vld [vmem:[#allocation11 + $0x28] sm:$0xff] }
 0x1b6   :  { %2184 = vmatprep.subr.bf16.mxu1 %v2183_v16  ;;  %v2269_v16 = vpack.c.bf16 %v1302_v51, %v1300_v50  ;;  %v2333_v63 = vpack.c.bf16 %v1517_v55, %v1516_v54  ;;  %v1327_v50 = vld [vmem:[#allocation8 + $0x318] sm:$0xff]  ;;  %v2289_v51 = vpack.c.bf16 %v1322_v48, %v1320_v47  ;;  %v2293_v54 = vpack.c.bf16 %v1326_v52, %v1324_v29  ;;  %v1524_v48 = vld [vmem:[#allocation11 + $0x60] sm:$0xff] }
 0x1b7   :  { %v1526_v52 = vld [vmem:[#allocation11 + $0x70] sm:$0xff] }
 0x1b9   :  { %2186 = vmatpush1.bf16.msra.mxu1 %v2185_v60  ;;  %v1306_v60 = vld [vmem:[#allocation8 + $0x270] sm:$0xff] }
 0x1ba   :  { %2188 = vmatprep.subr.bf16.mxu1 %v2187_v61  ;;  %v1309_v61 = vld [vmem:[#allocation8 + $0x288] sm:$0xff] }
 0x1bd   :  { %2190 = vmatpush1.bf16.msra.mxu1 %v2189_v1  ;;  %v1519_v1 = vld [vmem:[#allocation11 + $0x38] sm:$0xff] }
 0x1be   :  { %2192 = vmatprep.subr.bf16.mxu1 %v2191_v19  ;;  %v2273_v19 = vpack.c.bf16 %v1306_v60, %v1304_v59 }
 0x1c1   :  { %2194 = vmatpush1.bf16.msra.mxu1 %v2193_v6  ;;  %v2275_v6 = vpack.c.bf16 %v1311_v62, %v1309_v61  ;;  %v1332_v61 = vld [vmem:[#allocation8 + $0x340] sm:$0xff]  ;;  %v1334_v62 = vld [vmem:[#allocation8 + $0x350] sm:$0xff] }
 0x1c2   :  { %2324 = vmatprep.subr.bf16.mxu1 %v2323_v38  ;;  %v1316_v38 = vld [vmem:[#allocation8 + $0x2c0] sm:$0xff] }
 0x1c4   :  { %1218 = vmatmul.mubr.f32.vlgmr.msra.gmra.mrb[2].mxu1 %v2739_v33  ;;  %v725_v33 = vadd.f32 %v2747_v5, %v643_v13  ;;  %v1512_v5 = vld [vmem:[#allocation11] sm:$0xff] }
 0x1c5   :  { %v2325_v44 = vpack.c.bf16 %v1513_v39, %v1512_v5  ;;  %v1313_v13 = vld [vmem:[#allocation8 + $0x2a8] sm:$0xff]  ;;  %v1318_v39 = vld [vmem:[#allocation8 + $0x2d0] sm:$0xff] }
 0x1c7   :  { %2326 = vmatpush3.bf16.msra.mxu1 %v2325_v44  ;;  %v2347_v44 = vpack.c.bf16 %v1541_v37, %v1540_v2  ;;  %v1354_v2 = vld [vmem:[#allocation8 + $0x3f0] sm:$0xff] }
 0x1c8   :  { %2328 = vmatprep.subr.bf16.mxu1 %v2327_v45  ;;  %v2285_v45 = vpack.c.bf16 %v1318_v39, %v1316_v38  ;;  %v650_v38 = vsub.s32 3, %v2750_v8 }
 0x1ca   :  { %v651_v40 = vrot.slane %v2753_v10, %v650_v38 }
 0x1cb   :  { %2330 = vmatpush3.bf16.msra.mxu1 %v2329_v53  ;;  %v1329_v53 = vld [vmem:[#allocation8 + $0x328] sm:$0xff] }
 0x1cc   :  { %2332 = vmatprep.subr.bf16.mxu1 %v2331_v42  ;;  %v1331_v42 = vld [vmem:[#allocation8 + $0x338] sm:$0xff] }
 0x1cd   :  { %v2295_v55 = vpack.c.bf16 %v1331_v42, %v1329_v53  ;;  %v1527_v53 = vld [vmem:[#allocation11 + $0x78] sm:$0xff] }
 0x1ce   :  { %v2353_v42 = vpack.c.bf16 %v1527_v53, %v1526_v52 }
 0x1cf   :  { %2334 = vmatpush3.bf16.msra.mxu1 %v2333_v63  ;;  %v1337_v63 = vld [vmem:[#allocation8 + $0x368] sm:$0xff] }
 0x1d0   :  { %2336 = vmatprep.subr.bf16.mxu1 %v2335_v28  ;;  %v1339_v28 = vld [vmem:[#allocation8 + $0x378] sm:$0xff] }
 0x219   :  { %v935_v15 = vpop.f32.mrb[0].mxu0 }
 0x21a   :  { %v2356_v18 = vadd.f32 %v935_v15, %v723_v14  ;;  %v937_v20 = vpop.f32.mrb[1].mxu0  ;;  %v1315_v14 = vld [vmem:[#allocation8 + $0x2b8] sm:$0xff]  ;;  %v2339_v15 = vpack.c.bf16 %v1537_v4, %v1536_v3  ;;  %v1338_v3 = vld [vmem:[#allocation8 + $0x370] sm:$0xff]  ;;  %v1341_v4 = vld [vmem:[#allocation8 + $0x388] sm:$0xff] }
 0x21b   :  { %v2358_v23 = vadd.f32 %v937_v20, %v725_v33  ;;  %v2337_v33 = vpack.c.bf16 %v1519_v1, %v1518_v0  ;;  %v1521_v20 = vld [vmem:[#allocation11 + $0x48] sm:$0xff]  ;;  %v2279_v24 = vpack.c.bf16 %v1315_v14, %v1313_v13  ;;  %v2301_v0 = vpack.c.bf16 %v1334_v62, %v1332_v61  ;;  %v1340_v13 = vld [vmem:[#allocation8 + $0x380] sm:$0xff] }
 0x21c   :  { %v1224_v31 = vmax.f32 %v2356_v18, 0.0  ;;  %v1520_v18 = vld [vmem:[#allocation11 + $0x40] sm:$0xff]  ;;  %v2303_v1 = vpack.c.bf16 %v1339_v28, %v1337_v63  ;;  %v1342_v14 = vld [vmem:[#allocation8 + $0x390] sm:$0xff] }
 0x21d   :  { %v1225_v26 = vmax.f32 %v2358_v23, 0.0  ;;  %v1539_v23 = vld [vmem:[#allocation11 + $0xd8] sm:$0xff]  ;;  %2338 = vmatpush3.bf16.msra.mxu1 %v2337_v33  ;;  %v1345_v33 = vld [vmem:[#allocation8 + $0x3a8] sm:$0xff]  ;;  %v1646_v62 = vld [vmem:[#allocation13] ss:$0 sm:$0xff] }
 0x21e   :  { %2340 = vmatprep.subr.bf16.mxu1 %v2339_v15  ;;  %v1347_v15 = vld [vmem:[#allocation8 + $0x3b8] sm:$0xff] }
 0x21f   :  { %1432 = vmatprep.mubr.f32.mxu0 %v1225_v26  ;;  %v1314_v26 = vld [vmem:[#allocation8 + $0x2b0] sm:$0xff] }
 0x220   :  { %1433 = vmatmul.mubr.f32.vlgmr.msra.gmra.mrb[2].mxu0 %v1224_v31  ;;  %v2341_v31 = vpack.c.bf16 %v1521_v20, %v1520_v18  ;;  %v2281_v36 = vpack.c.bf16 %v1314_v26, %v1312_v25  ;;  %v2309_v18 = vpack.c.bf16 %v1342_v14, %v1340_v13  ;;  %v2311_v20 = vpack.c.bf16 %v1347_v15, %v1345_v33 }
 0x221   :  { %2262 = vmatpush1.bf16.msra.mxu0 %v2261_v27  ;;  %v1317_v27 = vld [vmem:[#allocation8 + $0x2c8] sm:$0xff] }
 0x222   :  { %2264 = vmatprep.subr.bf16.mxu0 %v2263_v32  ;;  %v2343_v32 = vpack.c.bf16 %v1539_v23, %v1538_v22  ;;  %v2283_v5 = vpack.c.bf16 %v1319_v30, %v1317_v27  ;;  %2342 = vmatpush3.bf16.msra.mxu1 %v2341_v31  ;;  %v1346_v22 = vld [vmem:[#allocation8 + $0x3b0] sm:$0xff]  ;;  %v1349_v23 = vld [vmem:[#allocation8 + $0x3c8] sm:$0xff]  ;;  %v1348_v27 = vld [vmem:[#allocation8 + $0x3c0] sm:$0xff] }
 0x223   :  { %v1350_v30 = vld [vmem:[#allocation8 + $0x3d0] sm:$0xff]  ;;  %v1353_v31 = vld [vmem:[#allocation8 + $0x3e8] sm:$0xff] }
 0x224   :  { %2344 = vmatprep.subr.bf16.mxu1 %v2343_v32  ;;  %v1355_v32 = vld [vmem:[#allocation8 + $0x3f8] sm:$0xff] }
 0x225   :  { %2266 = vmatpush1.bf16.msra.mxu0 %v2265_v43  ;;  %v2345_v43 = vpack.c.bf16 %v1523_v35, %v1522_v34  ;;  %v2317_v34 = vpack.c.bf16 %v1350_v30, %v1348_v27  ;;  %v2319_v35 = vpack.c.bf16 %v1355_v32, %v1353_v31 }
 0x226   :  { %2268 = vmatprep.subr.bf16.mxu0 %v2267_v49  ;;  %v1325_v49 = vld [vmem:[#allocation8 + $0x308] sm:$0xff] }
 0x227   :  { %2346 = vmatpush3.bf16.msra.mxu1 %v2345_v43  ;;  %v2291_v17 = vpack.c.bf16 %v1327_v50, %v1325_v49  ;;  %v1525_v49 = vld [vmem:[#allocation11 + $0x68] sm:$0xff] }
 0x228   :  { %2348 = vmatprep.subr.bf16.mxu1 %v2347_v44  ;;  %v2349_v50 = vpack.c.bf16 %v1525_v49, %v1524_v48 }
 0x229   :  { %2270 = vmatpush1.bf16.msra.mxu0 %v2269_v16  ;;  %v1328_v16 = vld [vmem:[#allocation8 + $0x320] sm:$0xff] }
 0x22a   :  { %2272 = vmatprep.subr.bf16.mxu0 %v2271_v58  ;;  %v1335_v58 = vld [vmem:[#allocation8 + $0x358] sm:$0xff]  ;;  %v2297_v59 = vpack.c.bf16 %v1330_v56, %v1328_v16 }
 0x22b   :  { %v2299_v60 = vpack.c.bf16 %v1335_v58, %v1333_v57  ;;  %2350 = vmatpush3.bf16.msra.mxu1 %v2349_v50 }
 0x22d   :  { %2274 = vmatpush1.bf16.msra.mxu0 %v2273_v19  ;;  %v1336_v19 = vld [vmem:[#allocation8 + $0x360] sm:$0xff] }
 0x22e   :  { %2276 = vmatprep.subr.bf16.mxu0 %v2275_v6  ;;  %v1343_v6 = vld [vmem:[#allocation8 + $0x398] sm:$0xff]  ;;  %v2305_v7 = vpack.c.bf16 %v1338_v3, %v1336_v19 }
 0x22f   :  { %v2307_v12 = vpack.c.bf16 %v1343_v6, %v1341_v4 }
 0x231   :  { %2278 = vmatpush1.bf16.msra.mxu0 %v2277_v21  ;;  %v1344_v21 = vld [vmem:[#allocation8 + $0x3a0] sm:$0xff] }
 0x232   :  { %2280 = vmatprep.subr.bf16.mxu0 %v2279_v24  ;;  %v1351_v24 = vld [vmem:[#allocation8 + $0x3d8] sm:$0xff]  ;;  %v2313_v25 = vpack.c.bf16 %v1346_v22, %v1344_v21 }
 0x233   :  { %v2315_v26 = vpack.c.bf16 %v1351_v24, %v1349_v23 }
 0x235   :  { %2282 = vmatpush1.bf16.msra.mxu0 %v2281_v36  ;;  %v1352_v36 = vld [vmem:[#allocation8 + $0x3e0] sm:$0xff] }
 0x236   :  { %2284 = vmatprep.subr.bf16.mxu0 %v2283_v5  ;;  %v2321_v37 = vpack.c.bf16 %v1354_v2, %v1352_v36  ;;  %v646_v5 = vsub.s32 2, %v2750_v8 }
 0x238   :  { %v647_v39 = vrot.slane %v2753_v10, %v646_v5  ;;  %v1356_v10 = vld [vmem:[#allocation10] sm:$0x3] }
 0x239   :  { %2286 = vmatpush1.bf16.msra.mxu0 %v2285_v45 }
 0x23a   :  { %2288 = vmatprep.subr.bf16.mxu0 %v2287_v46 }
 0x23d   :  { %2290 = vmatpush1.bf16.msra.mxu0 %v2289_v51  ;;  %v1542_v51 = vld [vmem:[#allocation11 + $0xf0] sm:$0xff] }
 0x23e   :  { %2292 = vmatprep.subr.bf16.mxu0 %v2291_v17  ;;  %v1543_v17 = vld [vmem:[#allocation11 + $0xf8] sm:$0xff] }
 0x23f   :  { %v2351_v29 = vpack.c.bf16 %v1543_v17, %v1542_v51 }
 0x241   :  { %2294 = vmatpush1.bf16.msra.mxu0 %v2293_v54  ;;  %2352 = vmatprep.subr.bf16.mxu1 %v2351_v29  ;;  %v1361_v54 = vrot.slane %v1356_v10, %v638_v9 }
 0x242   :  { %2296 = vmatprep.subr.bf16.mxu0 %v2295_v55  ;;  %2354 = vmatpush3.bf16.msra.mxu1 %v2353_v42  ;;  %v1365_v55 = vrot.slane %v1356_v10, %v642_v11 }
 0x245   :  { %2298 = vmatpush1.bf16.msra.mxu0 %v2297_v59 }
 0x246   :  { %2300 = vmatprep.subr.bf16.mxu0 %v2299_v60 }
 0x249   :  { %2302 = vmatpush1.bf16.msra.mxu0 %v2301_v0 }
 0x24a   :  { %2304 = vmatprep.subr.bf16.mxu0 %v2303_v1 }
 0x24d   :  { %2306 = vmatpush1.bf16.msra.mxu0 %v2305_v7 }
 0x24e   :  { %2308 = vmatprep.subr.bf16.mxu0 %v2307_v12 }
 0x251   :  { %2310 = vmatpush1.bf16.msra.mxu0 %v2309_v18 }
 0x252   :  { %2312 = vmatprep.subr.bf16.mxu0 %v2311_v20 }
 0x255   :  { %2314 = vmatpush1.bf16.msra.mxu0 %v2313_v25 }
 0x256   :  { %2316 = vmatprep.subr.bf16.mxu0 %v2315_v26 }
 0x259   :  { %2318 = vmatpush1.bf16.msra.mxu0 %v2317_v34 }
 0x25a   :  { %2320 = vmatprep.subr.bf16.mxu0 %v2319_v35 }
 0x25d   :  { %2322 = vmatpush1.bf16.msra.mxu0 %v2321_v37 }
 0x297   :  { %v1219_v41 = vpop.f32.mrb[2].mxu1 }
 0x298   :  { %v2359_v43 = vadd.f32 %v1219_v41, %v647_v39  ;;  %v1221_v44 = vpop.f32.mrb[3].mxu1 }
 0x299   :  { %v2360_v45 = vadd.f32 %v1221_v44, %v651_v40 }
 0x29a   :  { %v1226_v47 = vmax.f32 %v2359_v43, 0.0 }
 0x29b   :  { %v1227_v46 = vmax.f32 %v2360_v45, 0.0 }
 0x29d   :  { %1503 = vmatprep.mubr.f32.mxu0 %v1227_v46 }
 0x29e   :  { %1504 = vmatmul.mubr.f32.vlgmr.msra.gmra.mrb[2].mxu0 %v1226_v47 }
 0x371   :  { %v1505_v16 = vpop.f32.mrb[2].mxu0 }
 0x372   :  { %v2361_v56 = vadd.f32 %v1505_v16, %v1361_v54  ;;  %v1507_v57 = vpop.f32.mrb[3].mxu0 }
 0x373   :  { %v2362_v58 = vadd.f32 %v1507_v57, %v1365_v55 }
 0x374   :  { %v1510_v60 = vmax.f32 %v2361_v56, 0.0 }
 0x375   :  { %v1511_v59 = vmax.f32 %v2362_v58, 0.0 }
 0x377   :  { %1615 = vmatprep.mubr.f32.mxu1 %v1511_v59 }
 0x378   :  { %1616 = vmatmul.mubr.f32.vlgmr.msra.gmra.mrb[4].mxu1 %v1510_v60 }
 0x44b   :  { %v1680_v61 = vpop.f32.mrb[4].mxu1 }
 0x44c   :  { %v1681_v63 = vpop.f32.mrb[5].mxu1 }
 0x44d   :  { %v1682_v28 = vadd.f32 %v1681_v63, %v1680_v61 }
 0x44f   :  { %v1618_v0 = vadd.f32 %v1682_v28, %v1646_v62 }
 0x451   :  { %v1647_v1 = vmul.f32 -1.442695, %v1618_v0 }
 0x453   :  { %2389 = vpow2.f32 %v1647_v1 }
 0x45d   :  { %v2390_v19 = vpop.eup %2389 }
 0x45e   :  { %v1624_v9 = vadd.f32 1.0, %v2390_v19 }
 0x460   :  { %2391 = vrcp.f32 %v1624_v9 }
 0x46a   :  { %v2392_v8 = vpop.eup %2391 }
 0x46b   :  { %1627 = vst [vmem:[#allocation14] sm:$0xff] %v2392_v8 }
 0x46c   :  { %2559 = shalt.err (!%p2556_p4)
}
 0x46d   :  { %s2560_s15 = scalar_lea.hbm %s2791_s7, 128 }
 0x46e   :  { %p2561_p5 = scmp.ne.s32.totalorder %s2791_s7, %s2560_s15  ;;  %p2564_p6 = scmp.lt.u32.totalorder %s2560_s15, %s2791_s7 }
 0x470   :  { %p2566_p7 = pnand %p2564_p6, %p2561_p5 }
 0x472   :  { %2569 = shalt.err (!%p2566_p7)
}
 0x473   :  { %1637 = dma.vmem_to_hbm [thread:$0]  %s1635_s13, 128, %s2791_s7, [#allocation4]  }
 0x474   :  { %2578 = dma.done.wait [#allocation4], 128  }
 0x475   :  { %2579 = vsyncadd [#allocation4], 4294967168 }
 0x476   :  { %1641 = vsyncpa [#allocation3], 1 }
 0x477   :  { %1642 = vsyncpa [#allocation6], 1 }
 0x478   :  { %1643 = vsyncpa [#allocation9], 1 }
 0x479   :  { %1644 = vsyncpa [#allocation12], 1 }
 0x47a   :  { %1645 = vsyncpa [#allocation4], 1 }

</bundles_post_ra>
